<compile_context>
chip_gen: v7x
topology: tpu7x:2x2x1
jax: 0.10.0
libtpu: 0.0.40
codegen_flags: <defaults>
</compile_context>

<pallas_src>
import functools

import jax
import jax.numpy as jnp
from jax.experimental import pallas as pl
from jax.experimental.pallas import tpu as pltpu


# ----------------------------------------------------------------------------
# In-kernel helpers
# ----------------------------------------------------------------------------
def _elu(x):
    return jnp.where(x > 0.0, x, jnp.exp(x) - 1.0)


def _row_normalize(adj):
    """rows scaled by 1/rowsum, zero rows left untouched (rowsum -> 1)."""
    rowsum = jnp.sum(adj, axis=-1, keepdims=True)
    rowsum = jnp.where(rowsum == 0.0, 1.0, rowsum)
    return adj / rowsum


def _het_gcn_side(x_a, x_b, adj_n, vk, vq):
    """One HetGCNLayer (+ EncoderLayer ReLU) for one node type.

    x_a: (bb, Na, D)  x_b: (bb, Nb, D)  adj_n: (bb, Na, Nb) row-normalized.
    vk = wv_k @ W_k  (1, D),  vq = wv_q @ W_q  (1, D)   (folded at prep time).
    """
    bb, na, d = x_a.shape
    m = bb * na

    # neighbour aggregation: one batched MXU dot with pre-normalized adjacency
    compat = jnp.einsum("bij,bjd->bid", adj_n, x_b,
                        preferred_element_type=jnp.float32)        # (bb, Na, D)

    xa_f = x_a.reshape(m, d)                                       # aligned (m % 8 == 0)
    cf = compat.reshape(m, d)

    # Folded attention logits (VPU multiply + cross-lane reduce; no D x D
    # matmuls):  s_* = elu( x.(wv_k@W_k) + x_a.(wv_q@W_q) )
    q_term = jnp.sum(xa_f * vq, axis=-1, keepdims=True)            # (m, 1)
    s_self = _elu(jnp.sum(xa_f * vk, axis=-1, keepdims=True) + q_term)
    s_nb = _elu(jnp.sum(cf * vk, axis=-1, keepdims=True) + q_term)

    # softmax over the two logits, blend x_a with compat, EncoderLayer ReLU
    mx = jnp.maximum(s_self, s_nb)
    e_s = jnp.exp(s_self - mx)
    e_n = jnp.exp(s_nb - mx)
    inv = pl.reciprocal(e_s + e_n)                                  # exact mode
    out = (e_s * inv) * xa_f + (e_n * inv) * cf
    out = jnp.maximum(out, 0.0)                                     # activate=True
    return out.reshape(bb, na, d)


# ----------------------------------------------------------------------------
# Fused encoder kernel
# ----------------------------------------------------------------------------
def _encoder_kernel(shelf_in_ref, item_feat_ref, adj_ref, adj_t_ref,
                    w_shelf_ref, w_item_ref, b_item_ref,
                    s_vk_ref, s_vq_ref, i_vk_ref, i_vq_ref,
                    shelf_out_ref, item_out_ref, *, num_layers):
    bb, nsp, fc = shelf_in_ref.shape
    _, nip, fi = item_feat_ref.shape
    d = w_item_ref.shape[1]

    # ---- init embeddings: batch folded into the matmul M dimension.
    # shelf_in carries [depot | shelf | indicator] columns and w_shelf carries
    # [Wd^T ; Ws^T ; b_d ; b_s] rows -> depot + shelf init linears (with
    # biases) in a single MXU push.
    shelf = jnp.dot(shelf_in_ref[...].reshape(bb * nsp, fc), w_shelf_ref[...],
                    preferred_element_type=jnp.float32).reshape(bb, nsp, d)
    item = (jnp.dot(item_feat_ref[...].reshape(bb * nip, fi), w_item_ref[...],
                    preferred_element_type=jnp.float32)
            + b_item_ref[...]).reshape(bb, nip, d)

    # ---- normalized adjacencies: computed once, reused by every layer
    adj_n = _row_normalize(adj_ref[...])       # (bb, nsp, nip)  shelf side
    adjt_n = _row_normalize(adj_t_ref[...])    # (bb, nip, nsp)  item side

    # ---- HetGCN layers (statically unrolled; item side uses *previous* shelf)
    for l in range(num_layers):
        new_shelf = _het_gcn_side(shelf, item, adj_n, s_vk_ref[l], s_vq_ref[l])
        new_item = _het_gcn_side(item, shelf, adjt_n, i_vk_ref[l], i_vq_ref[l])
        shelf, item = new_shelf, new_item

    shelf_out_ref[...] = shelf.astype(shelf_out_ref.dtype)
    item_out_ref[...] = item.astype(item_out_ref.dtype)


# ----------------------------------------------------------------------------
# Parameter preparation (one-time, outside the forward pass)
# ----------------------------------------------------------------------------
def prepare_encoder_params(params):
    """Re-layout PyTorch-style parameters into kernel form once:
    pre-transposed / fused init weights, and the rank-1 attention fold
      vk = wv_k @ W_k,   vq = wv_q @ W_q   (one D-vector each per layer/side)
    so the kernel never multiplies by W_q / W_k / W_v explicitly."""
    D = params["W_depot"].shape[0]
    w_shelf = jnp.concatenate(
        [jnp.transpose(params["W_depot"]),        # (2, D)
         jnp.transpose(params["W_shelf"]),        # (Fs, D)
         params["b_depot"][None, :],              # (1, D)
         params["b_shelf"][None, :]], axis=0)     # -> (2 + Fs + 2, D)

    def stack_side(side):
        vk, vq = [], []
        for layer in params["layers"]:
            p = layer[side]
            wv_k = p["wv"][:, :D]                 # K half of W_v (cat order (K, Q))
            wv_q = p["wv"][:, D:]                 # Q half
            vk.append(wv_k @ p["wk"])             # (1, D)
            vq.append(wv_q @ p["wq"])             # (1, D)
        return jnp.stack(vk), jnp.stack(vq)       # (L, 1, D)

    s_vk, s_vq = stack_side("shelf")
    i_vk, i_vq = stack_side("item")
    return {
        "w_shelf": w_shelf,
        "w_item": jnp.transpose(params["W_item"]),
        "b_item": params["b_item"][None, :],
        "s_vk": s_vk, "s_vq": s_vq,
        "i_vk": i_vk, "i_vq": i_vq,
    }


# ----------------------------------------------------------------------------
# Encoder forward (single pallas_call)
# ----------------------------------------------------------------------------
def _round_up(x, m):
    return ((x + m - 1) // m) * m


@functools.partial(jax.jit, static_argnames=("batch_block",))
def encoder_forward(prep, depot, shelf_feat, item_feat, supply_w_depot,
                    batch_block=None):
    f32 = jnp.float32
    B, Ns, Fs = shelf_feat.shape
    _, Ni, Fi = item_feat.shape
    Ns1 = Ns + 1
    D = prep["w_item"].shape[1]
    L = prep["s_vk"].shape[0]
    Fc = prep["w_shelf"].shape[0]

    bb = B if batch_block is None else batch_block
    if B % bb != 0:
        raise ValueError("batch_block must divide the batch size")
    grid = (B // bb,)

    # Combined init features for the shelf side (depot + shelf in one matmul):
    #   columns = [depot_xy(2) | shelf_feat(Fs) | is_depot | is_shelf]
    row_depot = jnp.concatenate(
        [depot.astype(f32),
         jnp.zeros((B, 1, Fs), f32),
         jnp.ones((B, 1, 1), f32),
         jnp.zeros((B, 1, 1), f32)], axis=-1)
    row_shelf = jnp.concatenate(
        [jnp.zeros((B, Ns, 2), f32),
         shelf_feat.astype(f32),
         jnp.zeros((B, Ns, 1), f32),
         jnp.ones((B, Ns, 1), f32)], axis=-1)
    shelf_in = jnp.concatenate([row_depot, row_shelf], axis=1)       # (B, Ns1, Fc)

    # Zero-pad node counts to sublane multiples (8): all in-kernel reshapes
    # stay aligned, and padded rows (zero features, zero adjacency) never
    # influence real rows.
    Nsp = _round_up(Ns1, 8)
    Nip = _round_up(Ni, 8)
    shelf_in = jnp.pad(shelf_in, ((0, 0), (0, Nsp - Ns1), (0, 0)))
    item_in = jnp.pad(item_feat.astype(f32), ((0, 0), (0, Nip - Ni), (0, 0)))
    adj = jnp.pad(supply_w_depot.astype(f32),
                  ((0, 0), (0, Nsp - Ns1), (0, Nip - Ni)))
    # NOTE: this tiny (~1 KB) batched transpose is the only per-forward XLA
    # glue; the per-layer normalization / reuse of both adjacencies happens
    # entirely inside the kernel.
    adj_t = jnp.transpose(adj, (0, 2, 1))

    kernel = functools.partial(_encoder_kernel, num_layers=L)

    def batched(*tail):
        nt = len(tail)
        return pl.BlockSpec((bb,) + tail, lambda i: (i,) + (0,) * nt)

    def replicated(arr):
        nd = arr.ndim
        return pl.BlockSpec(arr.shape, lambda i: (0,) * nd)

    shelf_pad, item_pad = pl.pallas_call(
        kernel,
        out_shape=(jax.ShapeDtypeStruct((B, Nsp, D), f32),
                   jax.ShapeDtypeStruct((B, Nip, D), f32)),
        grid=grid,
        in_specs=[
            batched(Nsp, Fc),             # shelf init features (+ indicators)
            batched(Nip, Fi),             # item init features
            batched(Nsp, Nip),            # adjacency
            batched(Nip, Nsp),            # adjacency^T
            replicated(prep["w_shelf"]),
            replicated(prep["w_item"]),
            replicated(prep["b_item"]),
            replicated(prep["s_vk"]),
            replicated(prep["s_vq"]),
            replicated(prep["i_vk"]),
            replicated(prep["i_vq"]),
        ],
        out_specs=(
            pl.BlockSpec((bb, Nsp, D), lambda i: (i, 0, 0)),
            pl.BlockSpec((bb, Nip, D), lambda i: (i, 0, 0)),
        ),
        compiler_params=pltpu.CompilerParams(
            # with batch_block=B//2 on v7x, the batch axis shards over both TCs
            dimension_semantics=("parallel",)),
    )(shelf_in, item_in, adj, adj_t,
      prep["w_shelf"], prep["w_item"], prep["b_item"],
      prep["s_vk"], prep["s_vq"], prep["i_vk"], prep["i_vq"])

    shelf_embed = shelf_pad[:, :Ns1, :]
    # TODO(synk): add_dummy_item source not provided; implemented as appending
    # one all-zero item-embedding row.
    item_embed = jnp.concatenate(
        [item_pad[:, :Ni, :], jnp.zeros((B, 1, D), f32)], axis=1)
    return shelf_embed, item_embed


# ----------------------------------------------------------------------------
# Pure-JAX reference (mirrors the PyTorch module) for a correctness check
# ----------------------------------------------------------------------------
def _reference_forward(params, depot, shelf_feat, item_feat, adj):
    hp = jax.lax.Precision.HIGHEST

    def linear(x, w, b):
        return jnp.einsum("...i,oi->...o", x, w, precision=hp) + b

    def row_norm(a):
        rs = jnp.sum(a, axis=2, keepdims=True)
        rs = jnp.where(rs == 0.0, 1.0, rs)
        return a / rs

    def het(x_a, x_b, a, wq, wk, wv):
        an = row_norm(a)
        compat = jnp.einsum("bij,bjd->bid", an, x_b, precision=hp)
        q = jnp.einsum("bnd,od->bno", x_a, wq, precision=hp)
        k_self = jnp.einsum("bnd,od->bno", x_a, wk, precision=hp)
        k_nb = jnp.einsum("bnd,od->bno", compat, wk, precision=hp)
        c_self = jax.nn.elu(jnp.einsum(
            "bnd,od->bno", jnp.concatenate([k_self, q], -1), wv, precision=hp))
        c_nb = jax.nn.elu(jnp.einsum(
            "bnd,od->bno", jnp.concatenate([k_nb, q], -1), wv, precision=hp))
        w = jax.nn.softmax(jnp.concatenate([c_self, c_nb], -1), axis=-1)
        return w[..., 0:1] * x_a + w[..., 1:2] * compat

    shelf = jnp.concatenate(
        [linear(depot, params["W_depot"], params["b_depot"]),
         linear(shelf_feat, params["W_shelf"], params["b_shelf"])], axis=1)
    item = linear(item_feat, params["W_item"], params["b_item"])
    adj_t = jnp.transpose(adj, (0, 2, 1))
    for layer in params["layers"]:
        new_shelf = jax.nn.relu(het(shelf, item, adj,
                                    layer["shelf"]["wq"], layer["shelf"]["wk"],
                                    layer["shelf"]["wv"]))
        new_item = jax.nn.relu(het(item, shelf, adj_t,
                                   layer["item"]["wq"], layer["item"]["wk"],
                                   layer["item"]["wv"]))
        shelf, item = new_shelf, new_item
    item = jnp.concatenate([item, jnp.zeros_like(item[:, :1, :])], axis=1)
    return shelf, item


# ----------------------------------------------------------------------------
# Deterministic parameter init (PyTorch-layout, shapes from the module)
# ----------------------------------------------------------------------------
def init_params(key, D, Fs, Fi, num_layers):
    keys = iter(jax.random.split(key, 6 + num_layers * 6))

    def w(shape, scale=0.1):
        return scale * jax.random.normal(next(keys), shape, dtype=jnp.float32)

    params = {
        "W_depot": w((D, 2)), "b_depot": w((D,)),
        "W_shelf": w((D, Fs)), "b_shelf": w((D,)),
        "W_item": w((D, Fi)), "b_item": w((D,)),
        "layers": [],
    }
    for _ in range(num_layers):
        layer = {}
        for name in ("shelf", "item"):
            layer[name] = {"wq": w((D, D)), "wk": w((D, D)), "wv": w((1, 2 * D))}
        params["layers"].append(layer)
    return params


if __name__ == "__main__":
    # B batches, Ns shelves (+1 depot), Ni items, embedding_dim D.
    # D = 128 keeps every activation / output lane-dense on the TPU.
    B, Ns, Ni, D = 2, 8, 8, 128
    Fs, Fi = 3, 4
    num_layers = 2                      # num_mhsa_layers

    key = jax.random.PRNGKey(0)
    k_par, k_dep, k_shf, k_itm, k_adj = jax.random.split(key, 5)

    params = init_params(k_par, D, Fs, Fi, num_layers)
    prep = prepare_encoder_params(params)       # one-time kernel-layout prep

    depot = jax.random.uniform(k_dep, (B, 1, 2), dtype=jnp.float32)
    shelf_feat = jax.random.uniform(k_shf, (B, Ns, Fs), dtype=jnp.float32)
    item_feat = jax.random.uniform(k_itm, (B, Ni, Fi), dtype=jnp.float32)
    supply_w_depot = jax.random.uniform(k_adj, (B, Ns + 1, Ni), dtype=jnp.float32)
    # exercise the zero-sum guards of row_normalize_adjacency (both sides)
    supply_w_depot = supply_w_depot.at[:, 3, :].set(0.0)
    supply_w_depot = supply_w_depot.at[:, :, 5].set(0.0)

    shelf_out, item_out = encoder_forward(
        prep, depot, shelf_feat, item_feat, supply_w_depot)
    jax.block_until_ready((shelf_out, item_out))

    assert shelf_out.shape == (B, Ns + 1, D)
    assert item_out.shape == (B, Ni + 1, D)

    ref_shelf, ref_item = _reference_forward(
        params, depot, shelf_feat, item_feat, supply_w_depot)
    assert jnp.allclose(shelf_out, ref_shelf, rtol=1e-2, atol=1e-2), \
        float(jnp.max(jnp.abs(shelf_out - ref_shelf)))
    assert jnp.allclose(item_out, ref_item, rtol=1e-2, atol=1e-2), \
        float(jnp.max(jnp.abs(item_out - ref_item)))

    print("KERNEL_OK")
</pallas_src>

<mosaic_0001>
module attributes {stable_mosaic.version = 11 : i64} {
  func.func @_encoder_kernel(%arg0: i32, %arg1: memref<2x16x7xf32, #tpu.memory_space<vmem>>, %arg2: memref<2x8x4xf32, #tpu.memory_space<vmem>>, %arg3: memref<2x16x8xf32, #tpu.memory_space<vmem>>, %arg4: memref<2x8x16xf32, #tpu.memory_space<vmem>>, %arg5: memref<7x128xf32, #tpu.memory_space<vmem>>, %arg6: memref<4x128xf32, #tpu.memory_space<vmem>>, %arg7: memref<1x128xf32, #tpu.memory_space<vmem>>, %arg8: memref<2x1x128xf32, #tpu.memory_space<vmem>>, %arg9: memref<2x1x128xf32, #tpu.memory_space<vmem>>, %arg10: memref<2x1x128xf32, #tpu.memory_space<vmem>>, %arg11: memref<2x1x128xf32, #tpu.memory_space<vmem>>, %arg12: memref<2x16x128xf32, #tpu.memory_space<vmem>>, %arg13: memref<2x8x128xf32, #tpu.memory_space<vmem>>) attributes {dimension_semantics = [#tpu.dimension_semantics<parallel>], iteration_bounds = array<i64: 1>, scalar_prefetch = 0 : i64, scratch_operands = 0 : i64, tpu.core_type = #tpu.core_type<tc>, window_params = [{transform_indices = @transform_0, window_bounds = array<i64: 2, 16, 7>}, {transform_indices = @transform_1, window_bounds = array<i64: 2, 8, 4>}, {transform_indices = @transform_2, window_bounds = array<i64: 2, 16, 8>}, {transform_indices = @transform_3, window_bounds = array<i64: 2, 8, 16>}, {pipeline_mode = #tpu.pipeline_mode<synchronous>, transform_indices = @transform_4, window_bounds = array<i64: 7, 128>}, {pipeline_mode = #tpu.pipeline_mode<synchronous>, transform_indices = @transform_5, window_bounds = array<i64: 4, 128>}, {pipeline_mode = #tpu.pipeline_mode<synchronous>, transform_indices = @transform_6, window_bounds = array<i64: 1, 128>}, {pipeline_mode = #tpu.pipeline_mode<synchronous>, transform_indices = @transform_7, window_bounds = array<i64: 2, 1, 128>}, {pipeline_mode = #tpu.pipeline_mode<synchronous>, transform_indices = @transform_8, window_bounds = array<i64: 2, 1, 128>}, {pipeline_mode = #tpu.pipeline_mode<synchronous>, transform_indices = @transform_9, window_bounds = array<i64: 2, 1, 128>}, {pipeline_mode = #tpu.pipeline_mode<synchronous>, transform_indices = @transform_10, window_bounds = array<i64: 2, 1, 128>}, {transform_indices = @transform_11, window_bounds = array<i64: 2, 16, 128>}, {transform_indices = @transform_12, window_bounds = array<i64: 2, 8, 128>}]} {
    %c0 = arith.constant 0 : index
    %c0_0 = arith.constant 0 : index
    %c0_1 = arith.constant 0 : index
    %0 = vector.load %arg1[%c0, %c0_0, %c0_1] : memref<2x16x7xf32, #tpu.memory_space<vmem>>, vector<2x16x7xf32>
    %1 = vector.shape_cast %0 : vector<2x16x7xf32> to vector<32x7xf32>
    %c0_2 = arith.constant 0 : index
    %c0_3 = arith.constant 0 : index
    %2 = vector.load %arg5[%c0_2, %c0_3] : memref<7x128xf32, #tpu.memory_space<vmem>>, vector<7x128xf32>
    %cst = arith.constant dense<0.000000e+00> : vector<32x128xf32>
    %3 = tpu.matmul %1, %2, %cst {dimension_numbers = #tpu.dot_dimension_numbers<[1], [0], [0], [1], [0, 0, 1, 1], [], []>} : vector<32x7xf32>, vector<7x128xf32>, vector<32x128xf32> -> vector<32x128xf32>
    %4 = vector.shape_cast %3 : vector<32x128xf32> to vector<2x16x128xf32>
    %c0_4 = arith.constant 0 : index
    %c0_5 = arith.constant 0 : index
    %c0_6 = arith.constant 0 : index
    %5 = vector.load %arg2[%c0_4, %c0_5, %c0_6] : memref<2x8x4xf32, #tpu.memory_space<vmem>>, vector<2x8x4xf32>
    %6 = vector.shape_cast %5 : vector<2x8x4xf32> to vector<16x4xf32>
    %c0_7 = arith.constant 0 : index
    %c0_8 = arith.constant 0 : index
    %7 = vector.load %arg6[%c0_7, %c0_8] : memref<4x128xf32, #tpu.memory_space<vmem>>, vector<4x128xf32>
    %cst_9 = arith.constant dense<0.000000e+00> : vector<16x128xf32>
    %8 = tpu.matmul %6, %7, %cst_9 {dimension_numbers = #tpu.dot_dimension_numbers<[1], [0], [0], [1], [0, 0, 1, 1], [], []>} : vector<16x4xf32>, vector<4x128xf32>, vector<16x128xf32> -> vector<16x128xf32>
    %c0_10 = arith.constant 0 : index
    %c0_11 = arith.constant 0 : index
    %9 = vector.load %arg7[%c0_10, %c0_11] : memref<1x128xf32, #tpu.memory_space<vmem>>, vector<1x128xf32>
    %10 = vector.broadcast %9 : vector<1x128xf32> to vector<16x128xf32>
    %11 = arith.addf %8, %10 : vector<16x128xf32>
    %12 = vector.shape_cast %11 : vector<16x128xf32> to vector<2x8x128xf32>
    %c0_12 = arith.constant 0 : index
    %c0_13 = arith.constant 0 : index
    %c0_14 = arith.constant 0 : index
    %13 = vector.load %arg3[%c0_12, %c0_13, %c0_14] : memref<2x16x8xf32, #tpu.memory_space<vmem>>, vector<2x16x8xf32>
    %cst_15 = arith.constant dense<0.000000e+00> : vector<2x16xf32>
    %14 = vector.multi_reduction <add>, %13, %cst_15 [2] : vector<2x16x8xf32> to vector<2x16xf32>
    %15 = vector.shape_cast %14 : vector<2x16xf32> to vector<2x16x1xf32>
    %cst_16 = arith.constant 0.000000e+00 : f32
    %16 = vector.broadcast %cst_16 : f32 to vector<2x16x1xf32>
    %17 = arith.cmpf oeq, %15, %16 : vector<2x16x1xf32>
    %cst_17 = arith.constant 1.000000e+00 : f32
    %18 = vector.broadcast %cst_17 : f32 to vector<2x16x1xf32>
    %19 = arith.select %17, %18, %15 : vector<2x16x1xi1>, vector<2x16x1xf32>
    %20 = vector.broadcast %19 : vector<2x16x1xf32> to vector<2x16x8xf32>
    %21 = arith.divf %13, %20 : vector<2x16x8xf32>
    %c0_18 = arith.constant 0 : index
    %c0_19 = arith.constant 0 : index
    %c0_20 = arith.constant 0 : index
    %22 = vector.load %arg4[%c0_18, %c0_19, %c0_20] : memref<2x8x16xf32, #tpu.memory_space<vmem>>, vector<2x8x16xf32>
    %cst_21 = arith.constant dense<0.000000e+00> : vector<2x8xf32>
    %23 = vector.multi_reduction <add>, %22, %cst_21 [2] : vector<2x8x16xf32> to vector<2x8xf32>
    %24 = vector.shape_cast %23 : vector<2x8xf32> to vector<2x8x1xf32>
    %cst_22 = arith.constant 0.000000e+00 : f32
    %25 = vector.broadcast %cst_22 : f32 to vector<2x8x1xf32>
    %26 = arith.cmpf oeq, %24, %25 : vector<2x8x1xf32>
    %cst_23 = arith.constant 1.000000e+00 : f32
    %27 = vector.broadcast %cst_23 : f32 to vector<2x8x1xf32>
    %28 = arith.select %26, %27, %24 : vector<2x8x1xi1>, vector<2x8x1xf32>
    %29 = vector.broadcast %28 : vector<2x8x1xf32> to vector<2x8x16xf32>
    %30 = arith.divf %22, %29 : vector<2x8x16xf32>
    %c0_24 = arith.constant 0 : index
    %c0_25 = arith.constant 0 : index
    %c0_26 = arith.constant 0 : index
    %31 = vector.load %arg8[%c0_24, %c0_25, %c0_26] : memref<2x1x128xf32, #tpu.memory_space<vmem>>, vector<1x1x128xf32>
    %32 = vector.shape_cast %31 : vector<1x1x128xf32> to vector<1x128xf32>
    %c0_27 = arith.constant 0 : index
    %c0_28 = arith.constant 0 : index
    %c0_29 = arith.constant 0 : index
    %33 = vector.load %arg9[%c0_27, %c0_28, %c0_29] : memref<2x1x128xf32, #tpu.memory_space<vmem>>, vector<1x1x128xf32>
    %34 = vector.shape_cast %33 : vector<1x1x128xf32> to vector<1x128xf32>
    "tpu.trace_start"() <{level = 10 : i32, message = "bij,bjd->bid"}> : () -> ()
    %cst_30 = arith.constant dense<0.000000e+00> : vector<2x16x128xf32>
    %35 = tpu.matmul %21, %12, %cst_30 {dimension_numbers = #tpu.dot_dimension_numbers<[2], [1], [1], [2], [0, 0, 0, 1, 1, 2], [0], [0]>} : vector<2x16x8xf32>, vector<2x8x128xf32>, vector<2x16x128xf32> -> vector<2x16x128xf32>
    "tpu.trace_stop"() : () -> ()
    %36 = vector.shape_cast %4 : vector<2x16x128xf32> to vector<32x128xf32>
    %37 = vector.shape_cast %35 : vector<2x16x128xf32> to vector<32x128xf32>
    %38 = vector.broadcast %34 : vector<1x128xf32> to vector<32x128xf32>
    %39 = arith.mulf %36, %38 : vector<32x128xf32>
    %cst_31 = arith.constant dense<0.000000e+00> : vector<32xf32>
    %40 = vector.multi_reduction <add>, %39, %cst_31 [1] : vector<32x128xf32> to vector<32xf32>
    %41 = vector.shape_cast %40 : vector<32xf32> to vector<32x1xf32>
    %42 = vector.broadcast %32 : vector<1x128xf32> to vector<32x128xf32>
    %43 = arith.mulf %36, %42 : vector<32x128xf32>
    %cst_32 = arith.constant dense<0.000000e+00> : vector<32xf32>
    %44 = vector.multi_reduction <add>, %43, %cst_32 [1] : vector<32x128xf32> to vector<32xf32>
    %45 = vector.shape_cast %44 : vector<32xf32> to vector<32x1xf32>
    %46 = arith.addf %45, %41 : vector<32x1xf32>
    %cst_33 = arith.constant 0.000000e+00 : f32
    %47 = vector.broadcast %cst_33 : f32 to vector<32x1xf32>
    %48 = arith.cmpf ogt, %46, %47 : vector<32x1xf32>
    %49 = math.exp %46 : vector<32x1xf32>
    %cst_34 = arith.constant 1.000000e+00 : f32
    %50 = vector.broadcast %cst_34 : f32 to vector<32x1xf32>
    %51 = arith.subf %49, %50 : vector<32x1xf32>
    %52 = arith.select %48, %46, %51 : vector<32x1xi1>, vector<32x1xf32>
    %53 = vector.broadcast %32 : vector<1x128xf32> to vector<32x128xf32>
    %54 = arith.mulf %37, %53 : vector<32x128xf32>
    %cst_35 = arith.constant dense<0.000000e+00> : vector<32xf32>
    %55 = vector.multi_reduction <add>, %54, %cst_35 [1] : vector<32x128xf32> to vector<32xf32>
    %56 = vector.shape_cast %55 : vector<32xf32> to vector<32x1xf32>
    %57 = arith.addf %56, %41 : vector<32x1xf32>
    %cst_36 = arith.constant 0.000000e+00 : f32
    %58 = vector.broadcast %cst_36 : f32 to vector<32x1xf32>
    %59 = arith.cmpf ogt, %57, %58 : vector<32x1xf32>
    %60 = math.exp %57 : vector<32x1xf32>
    %cst_37 = arith.constant 1.000000e+00 : f32
    %61 = vector.broadcast %cst_37 : f32 to vector<32x1xf32>
    %62 = arith.subf %60, %61 : vector<32x1xf32>
    %63 = arith.select %59, %57, %62 : vector<32x1xi1>, vector<32x1xf32>
    %64 = arith.maximumf %52, %63 : vector<32x1xf32>
    %65 = arith.subf %52, %64 : vector<32x1xf32>
    %66 = math.exp %65 : vector<32x1xf32>
    %67 = arith.subf %63, %64 : vector<32x1xf32>
    %68 = math.exp %67 : vector<32x1xf32>
    %69 = arith.addf %66, %68 : vector<32x1xf32>
    %70 = tpu.reciprocal %69 : vector<32x1xf32> -> vector<32x1xf32>
    %71 = arith.mulf %66, %70 : vector<32x1xf32>
    %72 = vector.broadcast %71 : vector<32x1xf32> to vector<32x128xf32>
    %73 = arith.mulf %72, %36 : vector<32x128xf32>
    %74 = arith.mulf %68, %70 : vector<32x1xf32>
    %75 = vector.broadcast %74 : vector<32x1xf32> to vector<32x128xf32>
    %76 = arith.mulf %75, %37 : vector<32x128xf32>
    %77 = arith.addf %73, %76 : vector<32x128xf32>
    %cst_38 = arith.constant 0.000000e+00 : f32
    %78 = vector.broadcast %cst_38 : f32 to vector<32x128xf32>
    %79 = arith.maximumf %77, %78 : vector<32x128xf32>
    %80 = vector.shape_cast %79 : vector<32x128xf32> to vector<2x16x128xf32>
    %c0_39 = arith.constant 0 : index
    %c0_40 = arith.constant 0 : index
    %c0_41 = arith.constant 0 : index
    %81 = vector.load %arg10[%c0_39, %c0_40, %c0_41] : memref<2x1x128xf32, #tpu.memory_space<vmem>>, vector<1x1x128xf32>
    %82 = vector.shape_cast %81 : vector<1x1x128xf32> to vector<1x128xf32>
    %c0_42 = arith.constant 0 : index
    %c0_43 = arith.constant 0 : index
    %c0_44 = arith.constant 0 : index
    %83 = vector.load %arg11[%c0_42, %c0_43, %c0_44] : memref<2x1x128xf32, #tpu.memory_space<vmem>>, vector<1x1x128xf32>
    %84 = vector.shape_cast %83 : vector<1x1x128xf32> to vector<1x128xf32>
    "tpu.trace_start"() <{level = 10 : i32, message = "bij,bjd->bid"}> : () -> ()
    %cst_45 = arith.constant dense<0.000000e+00> : vector<2x8x128xf32>
    %85 = tpu.matmul %30, %4, %cst_45 {dimension_numbers = #tpu.dot_dimension_numbers<[2], [1], [1], [2], [0, 0, 0, 1, 1, 2], [0], [0]>} : vector<2x8x16xf32>, vector<2x16x128xf32>, vector<2x8x128xf32> -> vector<2x8x128xf32>
    "tpu.trace_stop"() : () -> ()
    %86 = vector.shape_cast %12 : vector<2x8x128xf32> to vector<16x128xf32>
    %87 = vector.shape_cast %85 : vector<2x8x128xf32> to vector<16x128xf32>
    %88 = vector.broadcast %84 : vector<1x128xf32> to vector<16x128xf32>
    %89 = arith.mulf %86, %88 : vector<16x128xf32>
    %cst_46 = arith.constant dense<0.000000e+00> : vector<16xf32>
    %90 = vector.multi_reduction <add>, %89, %cst_46 [1] : vector<16x128xf32> to vector<16xf32>
    %91 = vector.shape_cast %90 : vector<16xf32> to vector<16x1xf32>
    %92 = vector.broadcast %82 : vector<1x128xf32> to vector<16x128xf32>
    %93 = arith.mulf %86, %92 : vector<16x128xf32>
    %cst_47 = arith.constant dense<0.000000e+00> : vector<16xf32>
    %94 = vector.multi_reduction <add>, %93, %cst_47 [1] : vector<16x128xf32> to vector<16xf32>
    %95 = vector.shape_cast %94 : vector<16xf32> to vector<16x1xf32>
    %96 = arith.addf %95, %91 : vector<16x1xf32>
    %cst_48 = arith.constant 0.000000e+00 : f32
    %97 = vector.broadcast %cst_48 : f32 to vector<16x1xf32>
    %98 = arith.cmpf ogt, %96, %97 : vector<16x1xf32>
    %99 = math.exp %96 : vector<16x1xf32>
    %cst_49 = arith.constant 1.000000e+00 : f32
    %100 = vector.broadcast %cst_49 : f32 to vector<16x1xf32>
    %101 = arith.subf %99, %100 : vector<16x1xf32>
    %102 = arith.select %98, %96, %101 : vector<16x1xi1>, vector<16x1xf32>
    %103 = vector.broadcast %82 : vector<1x128xf32> to vector<16x128xf32>
    %104 = arith.mulf %87, %103 : vector<16x128xf32>
    %cst_50 = arith.constant dense<0.000000e+00> : vector<16xf32>
    %105 = vector.multi_reduction <add>, %104, %cst_50 [1] : vector<16x128xf32> to vector<16xf32>
    %106 = vector.shape_cast %105 : vector<16xf32> to vector<16x1xf32>
    %107 = arith.addf %106, %91 : vector<16x1xf32>
    %cst_51 = arith.constant 0.000000e+00 : f32
    %108 = vector.broadcast %cst_51 : f32 to vector<16x1xf32>
    %109 = arith.cmpf ogt, %107, %108 : vector<16x1xf32>
    %110 = math.exp %107 : vector<16x1xf32>
    %cst_52 = arith.constant 1.000000e+00 : f32
    %111 = vector.broadcast %cst_52 : f32 to vector<16x1xf32>
    %112 = arith.subf %110, %111 : vector<16x1xf32>
    %113 = arith.select %109, %107, %112 : vector<16x1xi1>, vector<16x1xf32>
    %114 = arith.maximumf %102, %113 : vector<16x1xf32>
    %115 = arith.subf %102, %114 : vector<16x1xf32>
    %116 = math.exp %115 : vector<16x1xf32>
    %117 = arith.subf %113, %114 : vector<16x1xf32>
    %118 = math.exp %117 : vector<16x1xf32>
    %119 = arith.addf %116, %118 : vector<16x1xf32>
    %120 = tpu.reciprocal %119 : vector<16x1xf32> -> vector<16x1xf32>
    %121 = arith.mulf %116, %120 : vector<16x1xf32>
    %122 = vector.broadcast %121 : vector<16x1xf32> to vector<16x128xf32>
    %123 = arith.mulf %122, %86 : vector<16x128xf32>
    %124 = arith.mulf %118, %120 : vector<16x1xf32>
    %125 = vector.broadcast %124 : vector<16x1xf32> to vector<16x128xf32>
    %126 = arith.mulf %125, %87 : vector<16x128xf32>
    %127 = arith.addf %123, %126 : vector<16x128xf32>
    %cst_53 = arith.constant 0.000000e+00 : f32
    %128 = vector.broadcast %cst_53 : f32 to vector<16x128xf32>
    %129 = arith.maximumf %127, %128 : vector<16x128xf32>
    %130 = vector.shape_cast %129 : vector<16x128xf32> to vector<2x8x128xf32>
    %c1 = arith.constant 1 : index
    %c0_54 = arith.constant 0 : index
    %c0_55 = arith.constant 0 : index
    %131 = vector.load %arg8[%c1, %c0_54, %c0_55] : memref<2x1x128xf32, #tpu.memory_space<vmem>>, vector<1x1x128xf32>
    %132 = vector.shape_cast %131 : vector<1x1x128xf32> to vector<1x128xf32>
    %c1_56 = arith.constant 1 : index
    %c0_57 = arith.constant 0 : index
    %c0_58 = arith.constant 0 : index
    %133 = vector.load %arg9[%c1_56, %c0_57, %c0_58] : memref<2x1x128xf32, #tpu.memory_space<vmem>>, vector<1x1x128xf32>
    %134 = vector.shape_cast %133 : vector<1x1x128xf32> to vector<1x128xf32>
    "tpu.trace_start"() <{level = 10 : i32, message = "bij,bjd->bid"}> : () -> ()
    %cst_59 = arith.constant dense<0.000000e+00> : vector<2x16x128xf32>
    %135 = tpu.matmul %21, %130, %cst_59 {dimension_numbers = #tpu.dot_dimension_numbers<[2], [1], [1], [2], [0, 0, 0, 1, 1, 2], [0], [0]>} : vector<2x16x8xf32>, vector<2x8x128xf32>, vector<2x16x128xf32> -> vector<2x16x128xf32>
    "tpu.trace_stop"() : () -> ()
    %136 = vector.shape_cast %80 : vector<2x16x128xf32> to vector<32x128xf32>
    %137 = vector.shape_cast %135 : vector<2x16x128xf32> to vector<32x128xf32>
    %138 = vector.broadcast %134 : vector<1x128xf32> to vector<32x128xf32>
    %139 = arith.mulf %136, %138 : vector<32x128xf32>
    %cst_60 = arith.constant dense<0.000000e+00> : vector<32xf32>
    %140 = vector.multi_reduction <add>, %139, %cst_60 [1] : vector<32x128xf32> to vector<32xf32>
    %141 = vector.shape_cast %140 : vector<32xf32> to vector<32x1xf32>
    %142 = vector.broadcast %132 : vector<1x128xf32> to vector<32x128xf32>
    %143 = arith.mulf %136, %142 : vector<32x128xf32>
    %cst_61 = arith.constant dense<0.000000e+00> : vector<32xf32>
    %144 = vector.multi_reduction <add>, %143, %cst_61 [1] : vector<32x128xf32> to vector<32xf32>
    %145 = vector.shape_cast %144 : vector<32xf32> to vector<32x1xf32>
    %146 = arith.addf %145, %141 : vector<32x1xf32>
    %cst_62 = arith.constant 0.000000e+00 : f32
    %147 = vector.broadcast %cst_62 : f32 to vector<32x1xf32>
    %148 = arith.cmpf ogt, %146, %147 : vector<32x1xf32>
    %149 = math.exp %146 : vector<32x1xf32>
    %cst_63 = arith.constant 1.000000e+00 : f32
    %150 = vector.broadcast %cst_63 : f32 to vector<32x1xf32>
    %151 = arith.subf %149, %150 : vector<32x1xf32>
    %152 = arith.select %148, %146, %151 : vector<32x1xi1>, vector<32x1xf32>
    %153 = vector.broadcast %132 : vector<1x128xf32> to vector<32x128xf32>
    %154 = arith.mulf %137, %153 : vector<32x128xf32>
    %cst_64 = arith.constant dense<0.000000e+00> : vector<32xf32>
    %155 = vector.multi_reduction <add>, %154, %cst_64 [1] : vector<32x128xf32> to vector<32xf32>
    %156 = vector.shape_cast %155 : vector<32xf32> to vector<32x1xf32>
    %157 = arith.addf %156, %141 : vector<32x1xf32>
    %cst_65 = arith.constant 0.000000e+00 : f32
    %158 = vector.broadcast %cst_65 : f32 to vector<32x1xf32>
    %159 = arith.cmpf ogt, %157, %158 : vector<32x1xf32>
    %160 = math.exp %157 : vector<32x1xf32>
    %cst_66 = arith.constant 1.000000e+00 : f32
    %161 = vector.broadcast %cst_66 : f32 to vector<32x1xf32>
    %162 = arith.subf %160, %161 : vector<32x1xf32>
    %163 = arith.select %159, %157, %162 : vector<32x1xi1>, vector<32x1xf32>
    %164 = arith.maximumf %152, %163 : vector<32x1xf32>
    %165 = arith.subf %152, %164 : vector<32x1xf32>
    %166 = math.exp %165 : vector<32x1xf32>
    %167 = arith.subf %163, %164 : vector<32x1xf32>
    %168 = math.exp %167 : vector<32x1xf32>
    %169 = arith.addf %166, %168 : vector<32x1xf32>
    %170 = tpu.reciprocal %169 : vector<32x1xf32> -> vector<32x1xf32>
    %171 = arith.mulf %166, %170 : vector<32x1xf32>
    %172 = vector.broadcast %171 : vector<32x1xf32> to vector<32x128xf32>
    %173 = arith.mulf %172, %136 : vector<32x128xf32>
    %174 = arith.mulf %168, %170 : vector<32x1xf32>
    %175 = vector.broadcast %174 : vector<32x1xf32> to vector<32x128xf32>
    %176 = arith.mulf %175, %137 : vector<32x128xf32>
    %177 = arith.addf %173, %176 : vector<32x128xf32>
    %cst_67 = arith.constant 0.000000e+00 : f32
    %178 = vector.broadcast %cst_67 : f32 to vector<32x128xf32>
    %179 = arith.maximumf %177, %178 : vector<32x128xf32>
    %180 = vector.shape_cast %179 : vector<32x128xf32> to vector<2x16x128xf32>
    %c1_68 = arith.constant 1 : index
    %c0_69 = arith.constant 0 : index
    %c0_70 = arith.constant 0 : index
    %181 = vector.load %arg10[%c1_68, %c0_69, %c0_70] : memref<2x1x128xf32, #tpu.memory_space<vmem>>, vector<1x1x128xf32>
    %182 = vector.shape_cast %181 : vector<1x1x128xf32> to vector<1x128xf32>
    %c1_71 = arith.constant 1 : index
    %c0_72 = arith.constant 0 : index
    %c0_73 = arith.constant 0 : index
    %183 = vector.load %arg11[%c1_71, %c0_72, %c0_73] : memref<2x1x128xf32, #tpu.memory_space<vmem>>, vector<1x1x128xf32>
    %184 = vector.shape_cast %183 : vector<1x1x128xf32> to vector<1x128xf32>
    "tpu.trace_start"() <{level = 10 : i32, message = "bij,bjd->bid"}> : () -> ()
    %cst_74 = arith.constant dense<0.000000e+00> : vector<2x8x128xf32>
    %185 = tpu.matmul %30, %80, %cst_74 {dimension_numbers = #tpu.dot_dimension_numbers<[2], [1], [1], [2], [0, 0, 0, 1, 1, 2], [0], [0]>} : vector<2x8x16xf32>, vector<2x16x128xf32>, vector<2x8x128xf32> -> vector<2x8x128xf32>
    "tpu.trace_stop"() : () -> ()
    %186 = vector.shape_cast %130 : vector<2x8x128xf32> to vector<16x128xf32>
    %187 = vector.shape_cast %185 : vector<2x8x128xf32> to vector<16x128xf32>
    %188 = vector.broadcast %184 : vector<1x128xf32> to vector<16x128xf32>
    %189 = arith.mulf %186, %188 : vector<16x128xf32>
    %cst_75 = arith.constant dense<0.000000e+00> : vector<16xf32>
    %190 = vector.multi_reduction <add>, %189, %cst_75 [1] : vector<16x128xf32> to vector<16xf32>
    %191 = vector.shape_cast %190 : vector<16xf32> to vector<16x1xf32>
    %192 = vector.broadcast %182 : vector<1x128xf32> to vector<16x128xf32>
    %193 = arith.mulf %186, %192 : vector<16x128xf32>
    %cst_76 = arith.constant dense<0.000000e+00> : vector<16xf32>
    %194 = vector.multi_reduction <add>, %193, %cst_76 [1] : vector<16x128xf32> to vector<16xf32>
    %195 = vector.shape_cast %194 : vector<16xf32> to vector<16x1xf32>
    %196 = arith.addf %195, %191 : vector<16x1xf32>
    %cst_77 = arith.constant 0.000000e+00 : f32
    %197 = vector.broadcast %cst_77 : f32 to vector<16x1xf32>
    %198 = arith.cmpf ogt, %196, %197 : vector<16x1xf32>
    %199 = math.exp %196 : vector<16x1xf32>
    %cst_78 = arith.constant 1.000000e+00 : f32
    %200 = vector.broadcast %cst_78 : f32 to vector<16x1xf32>
    %201 = arith.subf %199, %200 : vector<16x1xf32>
    %202 = arith.select %198, %196, %201 : vector<16x1xi1>, vector<16x1xf32>
    %203 = vector.broadcast %182 : vector<1x128xf32> to vector<16x128xf32>
    %204 = arith.mulf %187, %203 : vector<16x128xf32>
    %cst_79 = arith.constant dense<0.000000e+00> : vector<16xf32>
    %205 = vector.multi_reduction <add>, %204, %cst_79 [1] : vector<16x128xf32> to vector<16xf32>
    %206 = vector.shape_cast %205 : vector<16xf32> to vector<16x1xf32>
    %207 = arith.addf %206, %191 : vector<16x1xf32>
    %cst_80 = arith.constant 0.000000e+00 : f32
    %208 = vector.broadcast %cst_80 : f32 to vector<16x1xf32>
    %209 = arith.cmpf ogt, %207, %208 : vector<16x1xf32>
    %210 = math.exp %207 : vector<16x1xf32>
    %cst_81 = arith.constant 1.000000e+00 : f32
    %211 = vector.broadcast %cst_81 : f32 to vector<16x1xf32>
    %212 = arith.subf %210, %211 : vector<16x1xf32>
    %213 = arith.select %209, %207, %212 : vector<16x1xi1>, vector<16x1xf32>
    %214 = arith.maximumf %202, %213 : vector<16x1xf32>
    %215 = arith.subf %202, %214 : vector<16x1xf32>
    %216 = math.exp %215 : vector<16x1xf32>
    %217 = arith.subf %213, %214 : vector<16x1xf32>
    %218 = math.exp %217 : vector<16x1xf32>
    %219 = arith.addf %216, %218 : vector<16x1xf32>
    %220 = tpu.reciprocal %219 : vector<16x1xf32> -> vector<16x1xf32>
    %221 = arith.mulf %216, %220 : vector<16x1xf32>
    %222 = vector.broadcast %221 : vector<16x1xf32> to vector<16x128xf32>
    %223 = arith.mulf %222, %186 : vector<16x128xf32>
    %224 = arith.mulf %218, %220 : vector<16x1xf32>
    %225 = vector.broadcast %224 : vector<16x1xf32> to vector<16x128xf32>
    %226 = arith.mulf %225, %187 : vector<16x128xf32>
    %227 = arith.addf %223, %226 : vector<16x128xf32>
    %cst_82 = arith.constant 0.000000e+00 : f32
    %228 = vector.broadcast %cst_82 : f32 to vector<16x128xf32>
    %229 = arith.maximumf %227, %228 : vector<16x128xf32>
    %230 = vector.shape_cast %229 : vector<16x128xf32> to vector<2x8x128xf32>
    %c0_83 = arith.constant 0 : index
    %c0_84 = arith.constant 0 : index
    %c0_85 = arith.constant 0 : index
    %231 = vector.load %arg12[%c0_83, %c0_84, %c0_85] : memref<2x16x128xf32, #tpu.memory_space<vmem>>, vector<2x16x128xf32>
    tpu.vector_store %arg12[%c0_83, %c0_84, %c0_85], %180 {strides = array<i32>} : memref<2x16x128xf32, #tpu.memory_space<vmem>>, vector<2x16x128xf32>,
    %c0_86 = arith.constant 0 : index
    %c0_87 = arith.constant 0 : index
    %c0_88 = arith.constant 0 : index
    %232 = vector.load %arg13[%c0_86, %c0_87, %c0_88] : memref<2x8x128xf32, #tpu.memory_space<vmem>>, vector<2x8x128xf32>
    tpu.vector_store %arg13[%c0_86, %c0_87, %c0_88], %230 {strides = array<i32>} : memref<2x8x128xf32, #tpu.memory_space<vmem>>, vector<2x8x128xf32>,
    return
  }
  func.func @transform_0(%arg0: i32) -> (i32, i32, i32) {
    %c0_i32 = arith.constant 0 : i32
    %c0_i32_0 = arith.constant 0 : i32
    %c0_i32_1 = arith.constant 0 : i32
    return %arg0, %c0_i32, %c0_i32_0 : i32, i32, i32
  }
  func.func @transform_1(%arg0: i32) -> (i32, i32, i32) {
    %c0_i32 = arith.constant 0 : i32
    %c0_i32_0 = arith.constant 0 : i32
    %c0_i32_1 = arith.constant 0 : i32
    return %arg0, %c0_i32, %c0_i32_0 : i32, i32, i32
  }
  func.func @transform_2(%arg0: i32) -> (i32, i32, i32) {
    %c0_i32 = arith.constant 0 : i32
    %c0_i32_0 = arith.constant 0 : i32
    %c0_i32_1 = arith.constant 0 : i32
    return %arg0, %c0_i32, %c0_i32_0 : i32, i32, i32
  }
  func.func @transform_3(%arg0: i32) -> (i32, i32, i32) {
    %c0_i32 = arith.constant 0 : i32
    %c0_i32_0 = arith.constant 0 : i32
    %c0_i32_1 = arith.constant 0 : i32
    return %arg0, %c0_i32, %c0_i32_0 : i32, i32, i32
  }
  func.func @transform_4(%arg0: i32) -> (i32, i32) {
    %c0_i32 = arith.constant 0 : i32
    %c0_i32_0 = arith.constant 0 : i32
    %c0_i32_1 = arith.constant 0 : i32
    return %c0_i32, %c0_i32_0 : i32, i32
  }
  func.func @transform_5(%arg0: i32) -> (i32, i32) {
    %c0_i32 = arith.constant 0 : i32
    %c0_i32_0 = arith.constant 0 : i32
    %c0_i32_1 = arith.constant 0 : i32
    return %c0_i32, %c0_i32_0 : i32, i32
  }
  func.func @transform_6(%arg0: i32) -> (i32, i32) {
    %c0_i32 = arith.constant 0 : i32
    %c0_i32_0 = arith.constant 0 : i32
    %c0_i32_1 = arith.constant 0 : i32
    return %c0_i32, %c0_i32_0 : i32, i32
  }
  func.func @transform_7(%arg0: i32) -> (i32, i32, i32) {
    %c0_i32 = arith.constant 0 : i32
    %c0_i32_0 = arith.constant 0 : i32
    %c0_i32_1 = arith.constant 0 : i32
    %c0_i32_2 = arith.constant 0 : i32
    return %c0_i32, %c0_i32_0, %c0_i32_1 : i32, i32, i32
  }
  func.func @transform_8(%arg0: i32) -> (i32, i32, i32) {
    %c0_i32 = arith.constant 0 : i32
    %c0_i32_0 = arith.constant 0 : i32
    %c0_i32_1 = arith.constant 0 : i32
    %c0_i32_2 = arith.constant 0 : i32
    return %c0_i32, %c0_i32_0, %c0_i32_1 : i32, i32, i32
  }
  func.func @transform_9(%arg0: i32) -> (i32, i32, i32) {
    %c0_i32 = arith.constant 0 : i32
    %c0_i32_0 = arith.constant 0 : i32
    %c0_i32_1 = arith.constant 0 : i32
    %c0_i32_2 = arith.constant 0 : i32
    return %c0_i32, %c0_i32_0, %c0_i32_1 : i32, i32, i32
  }
  func.func @transform_10(%arg0: i32) -> (i32, i32, i32) {
    %c0_i32 = arith.constant 0 : i32
    %c0_i32_0 = arith.constant 0 : i32
    %c0_i32_1 = arith.constant 0 : i32
    %c0_i32_2 = arith.constant 0 : i32
    return %c0_i32, %c0_i32_0, %c0_i32_1 : i32, i32, i32
  }
  func.func @transform_11(%arg0: i32) -> (i32, i32, i32) {
    %c0_i32 = arith.constant 0 : i32
    %c0_i32_0 = arith.constant 0 : i32
    %c0_i32_1 = arith.constant 0 : i32
    return %arg0, %c0_i32, %c0_i32_0 : i32, i32, i32
  }
  func.func @transform_12(%arg0: i32) -> (i32, i32, i32) {
    %c0_i32 = arith.constant 0 : i32
    %c0_i32_0 = arith.constant 0 : i32
    %c0_i32_1 = arith.constant 0 : i32
    return %arg0, %c0_i32, %c0_i32_0 : i32, i32, i32
  }
}

</mosaic_0001>

<bundles_post_ra>
// kernel: encoder_forward.1
= control target key start
LH: loop header
LB: loop body
LE: loop exit
PB: predicated region body
PF: predicated region fallthrough
CT: control target
= control target key end

     0   :  { %vm58_vm0 = vcmask 1046528   ;;  %vm164_vm1 = vcmask 1043456   ;;  %vm45_vm2 = vcmask 56320   ;;  %vm157_vm3 = vcmask 31744   ;;  %s2156_s4 = inlined_call_operand.vmem [shape: f32[7,128], index: 4, kind: input, shape index: {}]   ;;  %s2157_s5 = inlined_call_operand.vmem [shape: f32[4,128], index: 5, kind: input, shape index: {}]   ;;  %s2158_s0 = inlined_call_operand.vmem [shape: f32[2,16,7], index: 0, kind: input, shape index: {}]   ;;  %s2159_s1 = inlined_call_operand.vmem [shape: f32[2,8,4], index: 1, kind: input, shape index: {}]   ;;  %s2160_s2 = inlined_call_operand.vmem [shape: f32[2,16,8], index: 2, kind: input, shape index: {}]   ;;  %s2161_s3 = inlined_call_operand.vmem [shape: f32[2,8,16], index: 3, kind: input, shape index: {}]   ;;  %s2162_s6 = inlined_call_operand.vmem [shape: f32[1,128], index: 6, kind: input, shape index: {}]   ;;  %s2163_s8 = inlined_call_operand.vmem [shape: f32[2,1,128], index: 8, kind: input, shape index: {}]   ;;  %s2164_s7 = inlined_call_operand.vmem [shape: f32[2,1,128], index: 7, kind: input, shape index: {}]   ;;  %s2165_s10 = inlined_call_operand.vmem [shape: f32[2,1,128], index: 10, kind: input, shape index: {}]   ;;  %s2166_s9 = inlined_call_operand.vmem [shape: f32[2,1,128], index: 9, kind: input, shape index: {}]   ;;  %s2167_s11 = inlined_call_operand.vmem [shape: f32[2,16,128], index: 11, kind: output, shape index: {0}]   ;;  %s2168_s12 = inlined_call_operand.vmem [shape: f32[2,8,128], index: 12, kind: output, shape index: {1}]  }
   0x1   :  { %v44_v0 = vld [vmem:[%s2156_s4] sm:$0x7f]  ;;  %vm247_vm4 = vcmask 64512   ;;  %v148_v4 = vld [vmem:[%s2159_s1 + $0x8] sm:$0xff]  ;;  %v42_v6 = vld [vmem:[%s2158_s0 + $0x10] sm:$0xff]  ;;  %vm278_vm5 = vcmask 130048  }
   0x2   :  { %v149_v1 = vld [vmem:[%s2157_s5] sm:$0xf]  ;;  %1486 = vmatprep.subr.msk.mxu0 %vm58_vm0, %v44_v0  ;;  %v41_v5 = vld [vmem:[%s2158_s0 + $0x8] sm:$0xff]  ;;  %v245_v10 = vld [vmem:[%s2160_s2 + $0x10] sm:$0xff]  ;;  %v1694_v57 = vmov 0.0|0.0   ;;  %vm1695_vm12 = vmmov 0  }
   0x3   :  { %v40_v2 = vld [vmem:[%s2158_s0] sm:$0xff]  ;;  %1494 = vmatprep.subr.msk.mxu1 %vm164_vm1, %v149_v1  ;;  %1487 = vmatpush3.msk.msra.mxu0 %vm58_vm0, %v44_v0  ;;  %v1796_v9 = vld [vmem:[%s2160_s2 + $0x8] sm:$0xff]  ;;  %v1808_v12 = vld [vmem:[%s2160_s2 + $0x18] sm:$0xff]  ;;  %v254_v14 = vsel %vm247_vm4, %v245_v10, 0.0  ;;  %v1696_v63 = vmov 0.0  }
   0x4   :  { %v147_v3 = vld [vmem:[%s2159_s1] sm:$0xff]  ;;  %1488 = vmatprep.mubr.msk.f32.mxu0 %vm45_vm2, %v40_v2  ;;  %1495 = vmatpush3.msk.msra.mxu1 %vm164_vm1, %v149_v1  ;;  %v251_v11 = vsel %vm247_vm4, %v1796_v9, 0.0  ;;  %v43_v13 = vld [vmem:[%s2158_s0 + $0x18] sm:$0xff]  ;;  %v257_v15 = vsel %vm247_vm4, %v1808_v12, 0.0  ;;  %v1826_v17 = vld [vmem:[%s2161_s3 + $0x8] sm:$0xff] }
   0x5   :  { %v243_v7 = vld [vmem:[%s2160_s2] sm:$0xff]  ;;  %1496 = vmatprep.mubr.msk.f32.mxu1 %vm157_vm3, %v147_v3  ;;  %1489 = vmatmul.mubr.msk.f32.vlgmr.msra.gmra.mrb[0].mxu0 %vm45_vm2, %v41_v5  ;;  %v282_v19 = vsel %vm278_vm5, %v1826_v17, 0.0 }
   0x6   :  { %v248_v8 = vsel %vm247_vm4, %v243_v7, 0.0  ;;  %1497 = vmatmul.mubr.msk.f32.vlgmr.msra.gmra.mrb[0].mxu1 %vm157_vm3, %v148_v4  ;;  %1491 = vmatprep.mubr.msk.f32.mxu0 %vm45_vm2, %v42_v6  ;;  %v1820_v16 = vld [vmem:[%s2161_s3] sm:$0xff] }
   0x7   :  { %249 = vadd.xlane.f32.xlu0 %v248_v8  ;;  %252 = vadd.xlane.f32.xlu1 %v251_v11  ;;  %v279_v18 = vsel %vm278_vm5, %v1820_v16, 0.0  ;;  %v1402_v36 = vld [vmem:[%s2162_s6] ss:$0 sm:$0xff] }
   0x8   :  { %v1410_v37 = vld [vmem:[%s2163_s8] ss:$0 sm:$0xff] }
   0x9   :  { %1492 = vmatmul.mubr.msk.f32.gmra.mrb[2].mxu0 %vm45_vm2, %v43_v13  ;;  %v1865_v50 = vld [vmem:[%s2164_s7] ss:$0 sm:$0xff] }
   0xa   :  { %v1422_v61 = vld [vmem:[%s2165_s10] ss:$0 sm:$0xff] }
   0xb   :  { %255 = vadd.xlane.f32.xlu0 %v254_v14  ;;  %258 = vadd.xlane.f32.xlu1 %v257_v15  ;;  %v1423_v2 = vld [vmem:[%s2166_s9] ss:$0 sm:$0xff] }
   0xf   :  { %280 = vadd.xlane.f32.xlu0 %v279_v18  ;;  %283 = vadd.xlane.f32.xlu1 %v282_v19 }
  0x94   :  { %v250_v20 = vpop.xlane.xlu0 %249  ;;  %v253_v28 = vpop.xlane.xlu1 %252 }
  0x95   :  { %vm260_vm6 = vcmp.eq.f32.partialorder %v250_v20, 0.0  ;;  %vm261_vm9 = vcmp.eq.f32.partialorder %v253_v28, 0.0 }
  0x96   :  { %v264_v21 = vsel %vm260_vm6, 1.0, %v250_v20  ;;  %v265_v33 = vsel %vm261_vm9, 1.0, %v253_v28 }
  0x97   :  { %1562 = vrcp.f32 %v264_v21 }
  0x98   :  { %v256_v22 = vpop.xlane.xlu0 %255  ;;  %v259_v29 = vpop.xlane.xlu1 %258 }
  0x99   :  { %vm262_vm7 = vcmp.eq.f32.partialorder %v256_v22, 0.0  ;;  %vm263_vm8 = vcmp.eq.f32.partialorder %v259_v29, 0.0 }
  0x9a   :  { %v266_v23 = vsel %vm262_vm7, 1.0, %v256_v22  ;;  %v267_v32 = vsel %vm263_vm8, 1.0, %v259_v29 }
  0x9b   :  { %1564 = vrcp.f32 %v266_v23 }
  0x9c   :  { %v281_v30 = vpop.xlane.xlu0 %280  ;;  %v284_v31 = vpop.xlane.xlu1 %283  ;;  %1566 = vrcp.f32 %v267_v32 }
  0x9d   :  { %vm285_vm10 = vcmp.eq.f32.partialorder %v281_v30, 0.0  ;;  %vm286_vm11 = vcmp.eq.f32.partialorder %v284_v31, 0.0  ;;  %1568 = vrcp.f32 %v265_v33 }
  0x9e   :  { %v287_v34 = vsel %vm285_vm10, 1.0, %v281_v30  ;;  %v288_v35 = vsel %vm286_vm11, 1.0, %v284_v31 }
  0x9f   :  { %1570 = vrcp.f32 %v287_v34 }
  0xa0   :  { %1572 = vrcp.f32 %v288_v35 }
  0xa1   :  { %v1563_v24 = vpop.eup %1562 }
  0xa2   :  { %v1832_v25 = vmul.f32 %v1563_v24, %v243_v7 }
  0xa4   :  { %1501 = vmatprep.mubr.msk.f32.mxu1 %vm247_vm4, %v1832_v25 }
  0xa5   :  { %v1565_v26 = vpop.eup %1564 }
  0xa6   :  { %v1836_v27 = vmul.f32 %v1565_v26, %v245_v10  ;;  %v1567_v38 = vpop.eup %1566 }
  0xa7   :  { %v1569_v41 = vpop.eup %1568  ;;  %v1859_v49 = vmul.f32 %v1567_v38, %v1808_v12 }
  0xa8   :  { %1506 = vmatprep.mubr.msk.f32.mxu0 %vm247_vm4, %v1836_v27  ;;  %v1872_v53 = vmul.f32 %v1569_v41, %v1796_v9 }
  0xa9   :  { %v1571_v51 = vpop.eup %1570 }
  0xaa   :  { %v1573_v54 = vpop.eup %1572  ;;  %v1890_v60 = vmul.f32 %v1571_v51, %v1820_v16 }
  0xab   :  { %v1896_v62 = vmul.f32 %v1573_v54, %v1826_v17 }
  0xd8   :  { %v1846_v39 = vpop.f32.mrb[0].mxu0 }
  0xd9   :  { %v1498_v40 = vpop.f32.mrb[0].mxu1  ;;  %v1850_v43 = vpop.f32.mrb[1].mxu0  ;;  %v464_v45 = vmul.f32 %v1846_v39, %v1410_v37  ;;  %v482_v58 = vmul.f32 %v1846_v39, %v1865_v50 }
  0xda   :  { %v1848_v42 = vadd.f32 %v1498_v40, %v1402_v36  ;;  %v234_v44 = vpop.f32.mrb[1].mxu1  ;;  %v1548_v46 = vpack.c.bf16 %v1846_v39, %v1850_v43  ;;  %v463_v48 = vmul.f32 %v1410_v37, %v1850_v43  ;;  %v481_v59 = vmul.f32 %v1865_v50, %v1850_v43 }
  0xdb   :  { %v1855_v47 = vadd.f32 %v1402_v36, %v234_v44  ;;  %469 = vadd.xlane.f32.xlu1 %v464_v45 }
  0xdc   :  { %1504 = vmatprep.subr.mxu0 %v1848_v42  ;;  %v1869_v52 = vpop.f32.mrb[2].mxu0  ;;  %467 = vadd.xlane.f32.xlu0 %v463_v48  ;;  %v768_v0 = vmul.f32 %v1422_v61, %v1848_v42  ;;  %v780_v3 = vmul.f32 %v1423_v2, %v1848_v42 }
  0xdd   :  { %1499 = vmatprep.subr.mxu1 %v1855_v47  ;;  %1505 = vmatpush3.msra.mxu0 %v1848_v42  ;;  %v1874_v55 = vpop.f32.mrb[3].mxu0  ;;  %v767_v1 = vmul.f32 %v1422_v61, %v1855_v47  ;;  %v779_v4 = vmul.f32 %v1423_v2, %v1855_v47  ;;  %v466_v5 = vmul.f32 %v1869_v52, %v1410_v37 }
  0xde   :  { %1500 = vmatpush3.msra.mxu1 %v1855_v47  ;;  %v1551_v56 = vpack.c.bf16 %v1869_v52, %v1874_v55  ;;  %1507 = vmatmul.mubr.msk.f32.vlgmr.msra.gmra.mrb[4].mxu0 %vm247_vm4, %v1859_v49  ;;  %v465_v6 = vmul.f32 %v1410_v37, %v1874_v55  ;;  %v484_v7 = vmul.f32 %v1869_v52, %v1865_v50 }
  0xdf   :  { %1502 = vmatmul.mubr.msk.f32.vlgmr.msra.gmra.mrb[2].mxu1 %vm247_vm4, %v1872_v53  ;;  %1547 = vmatprep.subr.bf16.mxu1 %v1694_v57  ;;  %v483_v8 = vmul.f32 %v1865_v50, %v1874_v55 }
  0xe0   :  { %1550 = vmatprep.subr.bf16.mxu0 %v1694_v57  ;;  %487 = vadd.xlane.f32.xlu1 %v482_v58 }
  0xe1   :  { %1549 = vmatpush3.bf16.msra.mxu1 %v1548_v46  ;;  %485 = vadd.xlane.f32.xlu0 %v481_v59 }
  0xe2   :  { %1552 = vmatpush3.bf16.msra.mxu0 %v1551_v56  ;;  %1513 = vmatprep.mubr.msk.f32.mxu1 %vm1695_vm12, %v1696_v63 }
  0xe3   :  { %1520 = vmatprep.mubr.msk.f32.mxu0 %vm1695_vm12, %v1696_v63 }
  0xe4   :  { %1514 = vmatmul.mubr.msk.f32.vlgmr.msra.gmra.mrb[4].mxu1 %vm278_vm5, %v1890_v60  ;;  %771 = vadd.xlane.f32.xlu1 %v768_v0 }
  0xe5   :  { %1521 = vmatmul.mubr.msk.f32.vlgmr.msra.gmra.mrb[6].mxu0 %vm278_vm5, %v1896_v62  ;;  %1525 = vmatprep.mubr.msk.f32.mxu1 %vm247_vm4, %v1832_v25 }
  0xe6   :  { %769 = vadd.xlane.f32.xlu0 %v767_v1  ;;  %1530 = vmatprep.mubr.msk.f32.mxu0 %vm247_vm4, %v1836_v27 }
  0xe8   :  { %783 = vadd.xlane.f32.xlu1 %v780_v3 }
  0xea   :  { %781 = vadd.xlane.f32.xlu0 %v779_v4 }
  0xec   :  { %473 = vadd.xlane.f32.xlu1 %v466_v5 }
  0xee   :  { %471 = vadd.xlane.f32.xlu0 %v465_v6 }
  0xf0   :  { %491 = vadd.xlane.f32.xlu1 %v484_v7 }
  0xf2   :  { %489 = vadd.xlane.f32.xlu0 %v483_v8 }
 0x168   :  { %v470_v23 = vpop.xlane.xlu1 %469 }
 0x169   :  { %v468_v24 = vpop.xlane.xlu0 %467 }
 0x16d   :  { %v488_v25 = vpop.xlane.xlu1 %487 }
 0x16e   :  { %v486_v26 = vpop.xlane.xlu0 %485  ;;  %v1945_v33 = vadd.f32 %v488_v25, %v470_v23 }
 0x16f   :  { %v1947_v34 = vadd.f32 %v486_v26, %v468_v24 }
 0x170   :  { %v503_v40 = vmul.f32 1.442695, %v1945_v33  ;;  %vm498_vm13 = vcmp.gt.f32.partialorder %v1945_v33, 0.0 }
 0x171   :  { %v772_v27 = vpop.xlane.xlu1 %771  ;;  %v501_v44 = vmul.f32 1.442695, %v1947_v34  ;;  %vm497_vm14 = vcmp.gt.f32.partialorder %v1947_v34, 0.0 }
 0x172   :  { %1574 = vpow2.f32 %v503_v40 }
 0x173   :  { %v770_v28 = vpop.xlane.xlu0 %769  ;;  %1576 = vpow2.f32 %v501_v44 }
 0x175   :  { %v784_v29 = vpop.xlane.xlu1 %783 }
 0x176   :  { %v1949_v36 = vadd.f32 %v784_v29, %v772_v27 }
 0x177   :  { %v782_v30 = vpop.xlane.xlu0 %781 }
 0x178   :  { %v1951_v38 = vadd.f32 %v782_v30, %v770_v28  ;;  %v791_v46 = vmul.f32 1.442695, %v1949_v36  ;;  %vm788_vm15 = vcmp.gt.f32.partialorder %v1949_v36, 0.0 }
 0x179   :  { %v474_v31 = vpop.xlane.xlu1 %473 }
 0x17a   :  { %v789_v48 = vmul.f32 1.442695, %v1951_v38  ;;  %1578 = vpow2.f32 %v791_v46  ;;  %vm787_vm0 = vcmp.gt.f32.partialorder %v1951_v38, 0.0 }
 0x17b   :  { %v472_v32 = vpop.xlane.xlu0 %471 }
 0x17c   :  { %1580 = vpow2.f32 %v789_v48  ;;  %v1575_v5 = vpop.eup %1574 }
 0x17d   :  { %v492_v35 = vpop.xlane.xlu1 %491  ;;  %v1577_v7 = vpop.eup %1576 }
 0x17e   :  { %v1954_v41 = vadd.f32 %v492_v35, %v474_v31  ;;  %v1412_v26 = vadd.f32 -1.0, %v1577_v7 }
 0x17f   :  { %v490_v37 = vpop.xlane.xlu0 %489 }
 0x180   :  { %v1957_v45 = vadd.f32 %v490_v37, %v472_v32  ;;  %v513_v44 = vsel %vm497_vm14, %v1947_v34, %v1412_v26  ;;  %vm500_vm2 = vcmp.gt.f32.partialorder %v1954_v41, 0.0 }
 0x182   :  { %v505_v51 = vmul.f32 1.442695, %v1957_v45  ;;  %vm499_vm6 = vcmp.gt.f32.partialorder %v1957_v45, 0.0 }
 0x1b1   :  { %v1929_v12 = vpop.f32.mrb[4].mxu0 }
 0x1b2   :  { %v1923_v9 = vpop.f32.mrb[2].mxu1  ;;  %v1933_v14 = vpop.f32.mrb[5].mxu0  ;;  %v520_v22 = vmul.f32 %v1929_v12, %v1865_v50 }
 0x1b3   :  { %v1925_v10 = vpop.f32.mrb[3].mxu1  ;;  %v518_v11 = vmul.f32 %v1923_v9, %v1865_v50  ;;  %v519_v21 = vmul.f32 %v1865_v50, %v1933_v14 }
 0x1b4   :  { %v517_v13 = vmul.f32 %v1865_v50, %v1925_v10  ;;  %v507_v50 = vmul.f32 1.442695, %v1954_v41 }
 0x1b5   :  { %523 = vadd.xlane.f32.xlu1 %v518_v11 }
 0x1b6   :  { %521 = vadd.xlane.f32.xlu0 %v517_v13  ;;  %1582 = vpow2.f32 %v507_v50  ;;  %v1579_v13 = vpop.eup %1578 }
 0x1b7   :  { %v1935_v15 = vpop.f32.mrb[4].mxu1  ;;  %1584 = vpow2.f32 %v505_v51 }
 0x1b8   :  { %v1515_v16 = vpop.f32.mrb[5].mxu1  ;;  %v1937_v17 = vpop.f32.mrb[6].mxu0  ;;  %v797_v18 = vmul.f32 %v1423_v2, %v1935_v15 }
 0x1b9   :  { %v798_v19 = vmul.f32 %v1423_v2, %v1937_v17  ;;  %v1522_v20 = vpop.f32.mrb[7].mxu0 }
 0x1ba   :  { %799 = vadd.xlane.f32.xlu0 %v797_v18 }
 0x1bb   :  { %801 = vadd.xlane.f32.xlu1 %v798_v19  ;;  %v1581_v19 = vpop.eup %1580 }
 0x1bc   :  { %v1424_v30 = vadd.f32 -1.0, %v1581_v19 }
 0x1be   :  { %525 = vadd.xlane.f32.xlu0 %v519_v21 }
 0x1bf   :  { %527 = vadd.xlane.f32.xlu1 %v520_v22 }
 0x1c0   :  { %v1583_v21 = vpop.eup %1582 }
 0x242   :  { %v524_v54 = vpop.xlane.xlu1 %523 }
 0x243   :  { %v530_v56 = vadd.f32 %v524_v54, %v470_v23  ;;  %v522_v58 = vpop.xlane.xlu0 %521  ;;  %v1585_v23 = vpop.eup %1584 }
 0x244   :  { %v529_v59 = vadd.f32 %v522_v58, %v468_v24  ;;  %v1413_v24 = vadd.f32 -1.0, %v1575_v5 }
 0x245   :  { %v539_v61 = vmul.f32 1.442695, %v530_v56  ;;  %vm534_vm1 = vcmp.gt.f32.partialorder %v530_v56, 0.0 }
 0x246   :  { %v537_v0 = vmul.f32 1.442695, %v529_v59  ;;  %v514_v37 = vsel %vm498_vm13, %v1945_v33, %v1413_v24  ;;  %vm533_vm3 = vcmp.gt.f32.partialorder %v529_v59, 0.0  ;;  %v795_v33 = vsel %vm787_vm0, %v1951_v38, %v1424_v30 }
 0x247   :  { %1586 = vpow2.f32 %v539_v61  ;;  %v800_v1 = vpop.xlane.xlu0 %799 }
 0x248   :  { %1588 = vpow2.f32 %v537_v0  ;;  %v803_v2 = vadd.f32 %v800_v1, %v770_v28  ;;  %v802_v3 = vpop.xlane.xlu1 %801  ;;  %v1425_v28 = vadd.f32 -1.0, %v1579_v13 }
 0x249   :  { %v1963_v4 = vadd.f32 %v802_v3, %v772_v27 }
 0x24a   :  { %v807_v6 = vmul.f32 1.442695, %v803_v2  ;;  %v796_v48 = vsel %vm788_vm15, %v1949_v36, %v1425_v28  ;;  %vm805_vm7 = vcmp.gt.f32.partialorder %v803_v2, 0.0 }
 0x24b   :  { %v809_v8 = vmul.f32 1.442695, %v1963_v4  ;;  %v526_v11 = vpop.xlane.xlu0 %525  ;;  %vm806_vm8 = vcmp.gt.f32.partialorder %v1963_v4, 0.0 }
 0x24c   :  { %1590 = vpow2.f32 %v807_v6  ;;  %v528_v16 = vpop.xlane.xlu1 %527  ;;  %v1966_v18 = vadd.f32 %v526_v11, %v472_v32  ;;  %v1414_v32 = vadd.f32 -1.0, %v1585_v23 }
 0x24d   :  { %1592 = vpow2.f32 %v809_v8  ;;  %v1968_v20 = vadd.f32 %v528_v16, %v474_v31  ;;  %v1415_v31 = vadd.f32 -1.0, %v1583_v21 }
 0x24e   :  { %v541_v22 = vmul.f32 1.442695, %v1966_v18  ;;  %v515_v61 = vsel %vm499_vm6, %v1957_v45, %v1414_v32  ;;  %vm535_vm9 = vcmp.gt.f32.partialorder %v1966_v18, 0.0 }
 0x24f   :  { %v543_v25 = vmul.f32 1.442695, %v1968_v20  ;;  %v516_v58 = vsel %vm500_vm2, %v1954_v41, %v1415_v31  ;;  %vm536_vm10 = vcmp.gt.f32.partialorder %v1968_v20, 0.0 }
 0x250   :  { %1594 = vpow2.f32 %v541_v22 }
 0x251   :  { %v1587_v27 = vpop.eup %1586  ;;  %1596 = vpow2.f32 %v543_v25 }
 0x252   :  { %v1589_v29 = vpop.eup %1588  ;;  %v1417_v35 = vadd.f32 -1.0, %v1587_v27 }
 0x253   :  { %v1416_v40 = vadd.f32 -1.0, %v1589_v29 }
 0x254   :  { %v550_v46 = vsel %vm534_vm1, %v530_v56, %v1417_v35 }
 0x255   :  { %v554_v50 = vmax.f32 %v514_v37, %v550_v46  ;;  %v549_v51 = vsel %vm533_vm3, %v529_v59, %v1416_v40 }
 0x256   :  { %v1591_v54 = vpop.eup %1590  ;;  %v553_v34 = vmax.f32 %v513_v44, %v549_v51 }
 0x257   :  { %v1593_v0 = vpop.eup %1592  ;;  %v558_v1 = vsub.f32 %v514_v37, %v554_v50  ;;  %v570_v56 = vsub.f32 %v550_v46, %v554_v50  ;;  %v1426_v3 = vadd.f32 -1.0, %v1591_v54 }
 0x258   :  { %v557_v5 = vsub.f32 %v513_v44, %v553_v34  ;;  %v569_v6 = vsub.f32 %v549_v51, %v553_v34  ;;  %v1427_v36 = vadd.f32 -1.0, %v1593_v0 }
 0x259   :  { %v563_v7 = vmul.f32 1.442695, %v558_v1  ;;  %v575_v59 = vmul.f32 1.442695, %v570_v56  ;;  %v813_v8 = vsel %vm805_vm7, %v803_v2, %v1426_v3 }
 0x25a   :  { %v1595_v38 = vpop.eup %1594  ;;  %v561_v41 = vmul.f32 1.442695, %v557_v5  ;;  %v573_v11 = vmul.f32 1.442695, %v569_v6  ;;  %v815_v45 = vmax.f32 %v795_v33, %v813_v8  ;;  %v814_v13 = vsel %vm806_vm8, %v1963_v4, %v1427_v36 }
 0x25b   :  { %v1597_v16 = vpop.eup %1596  ;;  %1598 = vpow2.f32 %v563_v7  ;;  %v816_v19 = vmax.f32 %v796_v48, %v814_v13  ;;  %v1418_v21 = vadd.f32 -1.0, %v1595_v38 }
 0x25c   :  { %1600 = vpow2.f32 %v575_v59  ;;  %v817_v22 = vsub.f32 %v795_v33, %v815_v45  ;;  %v823_v23 = vsub.f32 %v813_v8, %v815_v45  ;;  %v1419_v24 = vadd.f32 -1.0, %v1597_v16 }
 0x25d   :  { %1602 = vpow2.f32 %v561_v41  ;;  %v818_v2 = vsub.f32 %v796_v48, %v816_v19  ;;  %v824_v25 = vsub.f32 %v814_v13, %v816_v19  ;;  %v551_v26 = vsel %vm535_vm9, %v1966_v18, %v1418_v21 }
 0x25e   :  { %1604 = vpow2.f32 %v573_v11  ;;  %v819_v27 = vmul.f32 1.442695, %v817_v22  ;;  %v825_v4 = vmul.f32 1.442695, %v823_v23  ;;  %v552_v28 = vsel %vm536_vm10, %v1968_v20, %v1419_v24 }
 0x25f   :  { %v821_v29 = vmul.f32 1.442695, %v818_v2  ;;  %v827_v30 = vmul.f32 1.442695, %v824_v25  ;;  %v556_v31 = vmax.f32 %v516_v58, %v552_v28  ;;  %v555_v32 = vmax.f32 %v515_v61, %v551_v26 }
 0x260   :  { %1606 = vpow2.f32 %v819_v27 }
 0x261   :  { %1608 = vpow2.f32 %v825_v4  ;;  %v560_v35 = vsub.f32 %v516_v58, %v556_v31  ;;  %v572_v37 = vsub.f32 %v552_v28, %v556_v31  ;;  %v559_v40 = vsub.f32 %v515_v61, %v555_v32 }
 0x262   :  { %1610 = vpow2.f32 %v821_v29  ;;  %v571_v44 = vsub.f32 %v551_v26, %v555_v32 }
 0x263   :  { %1612 = vpow2.f32 %v827_v30  ;;  %v567_v46 = vmul.f32 1.442695, %v560_v35  ;;  %v579_v48 = vmul.f32 1.442695, %v572_v37  ;;  %v565_v18 = vmul.f32 1.442695, %v559_v40 }
 0x264   :  { %v577_v50 = vmul.f32 1.442695, %v571_v44 }
 0x265   :  { %v1599_v51 = vpop.eup %1598  ;;  %1614 = vpow2.f32 %v567_v46 }
 0x266   :  { %v1601_v54 = vpop.eup %1600  ;;  %1616 = vpow2.f32 %v579_v48 }
 0x267   :  { %v1603_v20 = vpop.eup %1602  ;;  %v582_v33 = vadd.f32 %v1601_v54, %v1599_v51  ;;  %1618 = vpow2.f32 %v565_v18 }
 0x268   :  { %v1605_v34 = vpop.eup %1604  ;;  %1620 = vpow2.f32 %v577_v50 }
 0x269   :  { %1622 = vrcp.f32 %v582_v33  ;;  %v581_v58 = vadd.f32 %v1605_v34, %v1603_v20 }
 0x26a   :  { %v1607_v0 = vpop.eup %1606 }
 0x26b   :  { %v1609_v61 = vpop.eup %1608  ;;  %1624 = vrcp.f32 %v581_v58 }
 0x26c   :  { %v1611_v1 = vpop.eup %1610  ;;  %v829_v56 = vadd.f32 %v1609_v61, %v1607_v0 }
 0x26d   :  { %v1613_v3 = vpop.eup %1612 }
 0x26e   :  { %1626 = vrcp.f32 %v829_v56  ;;  %v830_v5 = vadd.f32 %v1613_v3, %v1611_v1 }
 0x26f   :  { %v1615_v6 = vpop.eup %1614 }
 0x270   :  { %v1617_v36 = vpop.eup %1616  ;;  %1628 = vrcp.f32 %v830_v5 }
 0x271   :  { %v1619_v7 = vpop.eup %1618  ;;  %v584_v59 = vadd.f32 %v1617_v36, %v1615_v6 }
 0x272   :  { %v1621_v8 = vpop.eup %1620 }
 0x273   :  { %v1623_v38 = vpop.eup %1622  ;;  %1630 = vrcp.f32 %v584_v59  ;;  %v583_v41 = vadd.f32 %v1621_v8, %v1619_v7 }
 0x274   :  { %v598_v11 = vmul.f32 %v1623_v38, %v1601_v54  ;;  %v590_v45 = vmul.f32 %v1623_v38, %v1599_v51 }
 0x275   :  { %v1625_v13 = vpop.eup %1624  ;;  %1632 = vrcp.f32 %v583_v41 }
 0x276   :  { %v597_v16 = vmul.f32 %v1625_v13, %v1605_v34  ;;  %v589_v19 = vmul.f32 %v1625_v13, %v1603_v20  ;;  %v594_v21 = vmul.f32 %v1846_v39, %v590_v45  ;;  %v602_v22 = vmul.f32 %v1923_v9, %v598_v11 }
 0x278   :  { %v1627_v23 = vpop.eup %1626  ;;  %v593_v24 = vmul.f32 %v589_v19, %v1850_v43  ;;  %v601_v2 = vmul.f32 %v597_v16, %v1925_v10  ;;  %v606_v25 = vadd.f32 %v602_v22, %v594_v21 }
 0x279   :  { %v833_v26 = vmul.f32 %v1627_v23, %v1607_v0  ;;  %v837_v27 = vmul.f32 %v1627_v23, %v1609_v61 }
 0x27a   :  { %v1629_v4 = vpop.eup %1628  ;;  %v605_v28 = vadd.f32 %v601_v2, %v593_v24  ;;  %v2006_v18 = vmax.f32 %v606_v25, 0.0 }
 0x27b   :  { %v835_v29 = vmul.f32 %v833_v26, %v1855_v47  ;;  %v839_v30 = vmul.f32 %v837_v27, %v1935_v15  ;;  %v834_v31 = vmul.f32 %v1629_v4, %v1611_v1  ;;  %v838_v32 = vmul.f32 %v1629_v4, %v1613_v3  ;;  %v1448_v1 = vld [vmem:[%s2165_s10 + $0x1] ss:$0 sm:$0xff] }
 0x27c   :  { %v2004_v48 = vmax.f32 %v605_v28, 0.0 }
 0x27d   :  { %v1631_v35 = vpop.eup %1630  ;;  %v841_v39 = vadd.f32 %v839_v30, %v835_v29  ;;  %v836_v9 = vmul.f32 %v834_v31, %v1848_v42  ;;  %v840_v37 = vmul.f32 %v838_v32, %v1937_v17 }
 0x27e   :  { %v592_v43 = vmul.f32 %v1631_v35, %v1615_v6  ;;  %v600_v40 = vmul.f32 %v1631_v35, %v1617_v36 }
 0x27f   :  { %v1633_v10 = vpop.eup %1632  ;;  %v2002_v44 = vmax.f32 %v841_v39, 0.0  ;;  %v842_v46 = vadd.f32 %v840_v37, %v836_v9 }
 0x280   :  { %v599_v47 = vmul.f32 %v1633_v10, %v1621_v8  ;;  %v596_v15 = vmul.f32 %v1869_v52, %v592_v43  ;;  %v604_v50 = vmul.f32 %v1929_v12, %v600_v40  ;;  %v591_v51 = vmul.f32 %v1633_v10, %v1619_v7 }
 0x281   :  { %1523 = vmatprep.subr.mxu1 %v2002_v44  ;;  %v2011_v42 = vmax.f32 %v842_v46, 0.0  ;;  %v1554_v52 = vpack.c.bf16 %v2006_v18, %v2004_v48  ;;  %v1305_v5 = vmul.f32 %v1448_v1, %v2002_v44 }
 0x282   :  { %1524 = vmatpush3.msra.mxu1 %v2002_v44  ;;  %v608_v17 = vadd.f32 %v604_v50, %v596_v15  ;;  %v595_v54 = vmul.f32 %v591_v51, %v1874_v55  ;;  %v603_v20 = vmul.f32 %v599_v47, %v1933_v14  ;;  %v1434_v55 = vld [vmem:[%s2163_s8 + $0x1] ss:$0 sm:$0xff] }
 0x283   :  { %1528 = vmatprep.subr.mxu0 %v2011_v42  ;;  %1526 = vmatmul.mubr.msk.f32.vlgmr.msra.gmra.mrb[6].mxu1 %vm247_vm4, %v1872_v53  ;;  %v1005_v0 = vmul.f32 %v1434_v55, %v2004_v48  ;;  %v1306_v3 = vmul.f32 %v1448_v1, %v2011_v42 }
 0x284   :  { %1529 = vmatpush3.msra.mxu0 %v2011_v42  ;;  %1553 = vmatprep.subr.bf16.mxu1 %v1694_v57  ;;  %v2023_v12 = vmax.f32 %v608_v17, 0.0  ;;  %v607_v33 = vadd.f32 %v603_v20, %v595_v54 }
 0x285   :  { %1531 = vmatmul.mubr.msk.f32.vlgmr.msra.gmra.mrb[8].mxu0 %vm247_vm4, %v1859_v49  ;;  %1555 = vmatpush3.bf16.msra.mxu1 %v1554_v52 }
 0x286   :  { %1537 = vmatprep.mubr.msk.f32.mxu1 %vm1695_vm12, %v1696_v63  ;;  %1556 = vmatprep.subr.bf16.mxu0 %v1694_v57  ;;  %v1008_v53 = vmul.f32 %v1434_v55, %v2023_v12  ;;  %v2034_v14 = vmax.f32 %v607_v33, 0.0  ;;  %v1435_v57 = vld [vmem:[%s2164_s7 + $0x1] ss:$0 sm:$0xff] }
 0x287   :  { %1544 = vmatprep.mubr.msk.f32.mxu0 %vm1695_vm12, %v1696_v63  ;;  %v1026_v58 = vmul.f32 %v1435_v57, %v2023_v12  ;;  %v1024_v61 = vmul.f32 %v1435_v57, %v2006_v18  ;;  %v1023_v56 = vmul.f32 %v1435_v57, %v2004_v48 }
 0x288   :  { %1538 = vmatmul.mubr.msk.f32.vlgmr.msra.gmra.mrb[8].mxu1 %vm278_vm5, %v1890_v60  ;;  %1015 = vadd.xlane.f32.xlu1 %v1008_v53  ;;  %v1557_v49 = vpack.c.bf16 %v2023_v12, %v2034_v14  ;;  %v1007_v34 = vmul.f32 %v1434_v55, %v2034_v14  ;;  %v1025_v63 = vmul.f32 %v1435_v57, %v2034_v14 }
 0x289   :  { %v1006_v60 = vmul.f32 %v1434_v55, %v2006_v18 }
 0x28a   :  { %1558 = vmatpush3.bf16.msra.mxu0 %v1557_v49  ;;  %1013 = vadd.xlane.f32.xlu0 %v1007_v34 }
 0x28c   :  { %1033 = vadd.xlane.f32.xlu1 %v1026_v58 }
 0x28d   :  { %1545 = vmatmul.mubr.msk.f32.vlgmr.msra.gmra.mrb[10].mxu0 %vm278_vm5, %v1896_v62  ;;  %v1449_v62 = vld [vmem:[%s2166_s9 + $0x1] ss:$0 sm:$0xff] }
 0x28e   :  { %1031 = vadd.xlane.f32.xlu0 %v1025_v63  ;;  %v1318_v6 = vmul.f32 %v1449_v62, %v2011_v42  ;;  %v1317_v36 = vmul.f32 %v1449_v62, %v2002_v44 }
 0x290   :  { %1011 = vadd.xlane.f32.xlu1 %v1006_v60 }
 0x292   :  { %1009 = vadd.xlane.f32.xlu0 %v1005_v0 }
 0x294   :  { %1029 = vadd.xlane.f32.xlu1 %v1024_v61 }
 0x296   :  { %1027 = vadd.xlane.f32.xlu0 %v1023_v56 }
 0x298   :  { %1309 = vadd.xlane.f32.xlu1 %v1306_v3 }
 0x29a   :  { %1307 = vadd.xlane.f32.xlu0 %v1305_v5 }
 0x29c   :  { %1321 = vadd.xlane.f32.xlu1 %v1318_v6 }
 0x29e   :  { %1319 = vadd.xlane.f32.xlu0 %v1317_v36 }
 0x315   :  { %v1016_v2 = vpop.xlane.xlu1 %1015 }
 0x317   :  { %v1014_v25 = vpop.xlane.xlu0 %1013 }
 0x319   :  { %v1034_v26 = vpop.xlane.xlu1 %1033 }
 0x31a   :  { %v1038_v35 = vadd.f32 %v1034_v26, %v1016_v2 }
 0x31b   :  { %v1032_v27 = vpop.xlane.xlu0 %1031 }
 0x31c   :  { %v2082_v39 = vadd.f32 %v1032_v27, %v1014_v25  ;;  %v1049_v10 = vmul.f32 1.442695, %v1038_v35  ;;  %vm1042_vm4 = vcmp.gt.f32.partialorder %v1038_v35, 0.0 }
 0x31d   :  { %v1012_v4 = vpop.xlane.xlu1 %1011 }
 0x31e   :  { %v1047_v47 = vmul.f32 1.442695, %v2082_v39  ;;  %1634 = vpow2.f32 %v1049_v10  ;;  %vm1041_vm5 = vcmp.gt.f32.partialorder %v2082_v39, 0.0 }
 0x31f   :  { %v1010_v28 = vpop.xlane.xlu0 %1009 }
 0x320   :  { %1636 = vpow2.f32 %v1047_v47 }
 0x321   :  { %v1030_v29 = vpop.xlane.xlu1 %1029 }
 0x322   :  { %v2084_v37 = vadd.f32 %v1030_v29, %v1012_v4 }
 0x323   :  { %v1028_v30 = vpop.xlane.xlu0 %1027 }
 0x324   :  { %v2086_v40 = vadd.f32 %v1028_v30, %v1010_v28  ;;  %v1045_v50 = vmul.f32 1.442695, %v2084_v37  ;;  %vm1040_vm11 = vcmp.gt.f32.partialorder %v2084_v37, 0.0 }
 0x325   :  { %v1310_v31 = vpop.xlane.xlu1 %1309 }
 0x326   :  { %v1043_v51 = vmul.f32 1.442695, %v2086_v40  ;;  %1638 = vpow2.f32 %v1045_v50  ;;  %vm1039_vm12 = vcmp.gt.f32.partialorder %v2086_v40, 0.0 }
 0x327   :  { %v1308_v32 = vpop.xlane.xlu0 %1307 }
 0x328   :  { %1640 = vpow2.f32 %v1043_v51  ;;  %v1635_v0 = vpop.eup %1634 }
 0x329   :  { %v1322_v9 = vpop.xlane.xlu1 %1321 }
 0x32a   :  { %v2088_v46 = vadd.f32 %v1322_v9, %v1310_v31  ;;  %v1637_v1 = vpop.eup %1636 }
 0x32b   :  { %v1320_v43 = vpop.xlane.xlu0 %1319 }
 0x32c   :  { %v2091_v15 = vadd.f32 %v1320_v43, %v1308_v32  ;;  %v1329_v17 = vmul.f32 1.442695, %v2088_v46  ;;  %vm1326_vm13 = vcmp.gt.f32.partialorder %v2088_v46, 0.0 }
 0x32e   :  { %v1327_v54 = vmul.f32 1.442695, %v2091_v15  ;;  %1642 = vpow2.f32 %v1329_v17  ;;  %vm1325_vm15 = vcmp.gt.f32.partialorder %v2091_v15, 0.0 }
 0x330   :  { %1644 = vpow2.f32 %v1327_v54  ;;  %v1639_v3 = vpop.eup %1638 }
 0x332   :  { %v1641_v6 = vpop.eup %1640 }
 0x356   :  { %v2064_v7 = vpop.f32.mrb[6].mxu1 }
 0x357   :  { %v2066_v59 = vpop.f32.mrb[7].mxu1  ;;  %v1060_v8 = vmul.f32 %v2064_v7, %v1435_v57 }
 0x358   :  { %v2069_v38 = vpop.f32.mrb[8].mxu0  ;;  %v1059_v41 = vmul.f32 %v1435_v57, %v2066_v59 }
 0x359   :  { %v2072_v11 = vpop.f32.mrb[9].mxu0  ;;  %1065 = vadd.xlane.f32.xlu1 %v1060_v8  ;;  %v1062_v13 = vmul.f32 %v2069_v38, %v1435_v57  ;;  %v1643_v8 = vpop.eup %1642 }
 0x35a   :  { %1063 = vadd.xlane.f32.xlu0 %v1059_v41  ;;  %v1061_v19 = vmul.f32 %v1435_v57, %v2072_v11  ;;  %v1439_v41 = vadd.f32 -1.0, %v1635_v0 }
 0x35b   :  { %v2074_v45 = vpop.f32.mrb[8].mxu1 }
 0x35c   :  { %v1539_v16 = vpop.f32.mrb[9].mxu1  ;;  %v1335_v22 = vmul.f32 %v1449_v62, %v2074_v45  ;;  %v1058_v27 = vsel %vm1042_vm4, %v1038_v35, %v1439_v41 }
 0x35d   :  { %1069 = vadd.xlane.f32.xlu1 %v1062_v13  ;;  %v1645_v16 = vpop.eup %1644 }
 0x35e   :  { %1067 = vadd.xlane.f32.xlu0 %v1061_v19  ;;  %v1438_v19 = vadd.f32 -1.0, %v1637_v1 }
 0x360   :  { %v2078_v21 = vpop.f32.mrb[10].mxu0  ;;  %v1057_v29 = vsel %vm1041_vm5, %v2082_v39, %v1438_v19 }
 0x361   :  { %v1546_v23 = vpop.f32.mrb[11].mxu0  ;;  %v1336_v24 = vmul.f32 %v1449_v62, %v2078_v21 }
 0x362   :  { %1337 = vadd.xlane.f32.xlu0 %v1335_v22  ;;  %v1437_v23 = vadd.f32 -1.0, %v1639_v3 }
 0x363   :  { %1339 = vadd.xlane.f32.xlu1 %v1336_v24 }
 0x3e6   :  { %v1066_v20 = vpop.xlane.xlu1 %1065 }
 0x3e7   :  { %v1072_v52 = vadd.f32 %v1066_v20, %v1012_v4  ;;  %v1064_v33 = vpop.xlane.xlu0 %1063  ;;  %v1450_v4 = vadd.f32 -1.0, %v1645_v16 }
 0x3e8   :  { %v1071_v55 = vadd.f32 %v1064_v33, %v1010_v28 }
 0x3e9   :  { %v1081_v53 = vmul.f32 1.442695, %v1072_v52  ;;  %vm1076_vm14 = vcmp.gt.f32.partialorder %v1072_v52, 0.0  ;;  %v1333_v39 = vsel %vm1325_vm15, %v2091_v15, %v1450_v4 }
 0x3ea   :  { %v1079_v49 = vmul.f32 1.442695, %v1071_v55  ;;  %v1070_v34 = vpop.xlane.xlu1 %1069  ;;  %vm1075_vm0 = vcmp.gt.f32.partialorder %v1071_v55, 0.0 }
 0x3eb   :  { %1646 = vpow2.f32 %v1081_v53  ;;  %v1074_v57 = vadd.f32 %v1070_v34, %v1016_v2  ;;  %v1068_v58 = vpop.xlane.xlu0 %1067  ;;  %v1436_v2 = vadd.f32 -1.0, %v1641_v6 }
 0x3ec   :  { %1648 = vpow2.f32 %v1079_v49  ;;  %v2097_v63 = vadd.f32 %v1068_v58, %v1014_v25  ;;  %v1451_v25 = vadd.f32 -1.0, %v1643_v8 }
 0x3ed   :  { %v1085_v60 = vmul.f32 1.442695, %v1074_v57  ;;  %v1055_v43 = vsel %vm1039_vm12, %v2086_v40, %v1436_v2  ;;  %vm1078_vm1 = vcmp.gt.f32.partialorder %v1074_v57, 0.0 }
 0x3ee   :  { %v1083_v61 = vmul.f32 1.442695, %v2097_v63  ;;  %v1334_v35 = vsel %vm1326_vm13, %v2088_v46, %v1451_v25  ;;  %vm1077_vm2 = vcmp.gt.f32.partialorder %v2097_v63, 0.0 }
 0x3ef   :  { %1650 = vpow2.f32 %v1085_v60  ;;  %v1338_v56 = vpop.xlane.xlu0 %1337 }
 0x3f0   :  { %1652 = vpow2.f32 %v1083_v61  ;;  %v1340_v62 = vpop.xlane.xlu1 %1339  ;;  %v2100_v5 = vadd.f32 %v1338_v56, %v1308_v32 }
 0x3f1   :  { %v2102_v36 = vadd.f32 %v1340_v62, %v1310_v31  ;;  %v1056_v31 = vsel %vm1040_vm11, %v2084_v37, %v1437_v23 }
 0x3f2   :  { %v1345_v13 = vmul.f32 1.442695, %v2100_v5  ;;  %vm1343_vm3 = vcmp.gt.f32.partialorder %v2100_v5, 0.0 }
 0x3f3   :  { %v1347_v22 = vmul.f32 1.442695, %v2102_v36  ;;  %vm1344_vm6 = vcmp.gt.f32.partialorder %v2102_v36, 0.0 }
 0x3f4   :  { %1654 = vpow2.f32 %v1345_v13 }
 0x3f5   :  { %v1647_v24 = vpop.eup %1646  ;;  %1656 = vpow2.f32 %v1347_v22 }
 0x3f6   :  { %v1649_v26 = vpop.eup %1648  ;;  %v1441_v28 = vadd.f32 -1.0, %v1647_v24 }
 0x3f7   :  { %v1440_v30 = vadd.f32 -1.0, %v1649_v26 }
 0x3f8   :  { %v1092_v32 = vsel %vm1076_vm14, %v1072_v52, %v1441_v28 }
 0x3f9   :  { %v1651_v9 = vpop.eup %1650  ;;  %v1096_v10 = vmax.f32 %v1056_v31, %v1092_v32  ;;  %v1091_v47 = vsel %vm1075_vm0, %v1071_v55, %v1440_v30 }
 0x3fa   :  { %v1653_v50 = vpop.eup %1652  ;;  %v1095_v51 = vmax.f32 %v1055_v43, %v1091_v47  ;;  %v1443_v17 = vadd.f32 -1.0, %v1651_v9 }
 0x3fb   :  { %v1100_v54 = vsub.f32 %v1056_v31, %v1096_v10  ;;  %v1112_v20 = vsub.f32 %v1092_v32, %v1096_v10  ;;  %v1442_v37 = vadd.f32 -1.0, %v1653_v50 }
 0x3fc   :  { %v1099_v52 = vsub.f32 %v1055_v43, %v1095_v51  ;;  %v1111_v33 = vsub.f32 %v1091_v47, %v1095_v51  ;;  %v1094_v53 = vsel %vm1078_vm1, %v1074_v57, %v1443_v17 }
 0x3fd   :  { %v1105_v40 = vmul.f32 1.442695, %v1100_v54  ;;  %v1117_v46 = vmul.f32 1.442695, %v1112_v20  ;;  %v1098_v49 = vmax.f32 %v1058_v27, %v1094_v53  ;;  %v1093_v55 = vsel %vm1077_vm2, %v2097_v63, %v1442_v37 }
 0x3fe   :  { %v1655_v34 = vpop.eup %1654  ;;  %v1103_v15 = vmul.f32 1.442695, %v1099_v52  ;;  %v1115_v58 = vmul.f32 1.442695, %v1111_v33  ;;  %v1097_v60 = vmax.f32 %v1057_v29, %v1093_v55 }
 0x3ff   :  { %v1657_v0 = vpop.eup %1656  ;;  %1658 = vpow2.f32 %v1105_v40  ;;  %v1102_v61 = vsub.f32 %v1058_v27, %v1098_v49  ;;  %v1114_v1 = vsub.f32 %v1094_v53, %v1098_v49  ;;  %v1452_v56 = vadd.f32 -1.0, %v1655_v34 }
 0x400   :  { %1660 = vpow2.f32 %v1117_v46  ;;  %v1101_v57 = vsub.f32 %v1057_v29, %v1097_v60  ;;  %v1113_v3 = vsub.f32 %v1093_v55, %v1097_v60  ;;  %v1453_v62 = vadd.f32 -1.0, %v1657_v0 }
 0x401   :  { %1662 = vpow2.f32 %v1103_v15  ;;  %v1109_v6 = vmul.f32 1.442695, %v1102_v61  ;;  %v1121_v8 = vmul.f32 1.442695, %v1114_v1  ;;  %v1351_v63 = vsel %vm1343_vm3, %v2100_v5, %v1452_v56 }
 0x402   :  { %1664 = vpow2.f32 %v1115_v58  ;;  %v1107_v41 = vmul.f32 1.442695, %v1101_v57  ;;  %v1119_v13 = vmul.f32 1.442695, %v1113_v3  ;;  %v1352_v16 = vsel %vm1344_vm6, %v2102_v36, %v1453_v62 }
 0x403   :  { %1666 = vpow2.f32 %v1109_v6  ;;  %v1354_v19 = vmax.f32 %v1334_v35, %v1352_v16  ;;  %v1353_v22 = vmax.f32 %v1333_v39, %v1351_v63 }
 0x404   :  { %1668 = vpow2.f32 %v1121_v8 }
 0x405   :  { %1670 = vpow2.f32 %v1107_v41  ;;  %v1356_v23 = vsub.f32 %v1334_v35, %v1354_v19  ;;  %v1362_v24 = vsub.f32 %v1352_v16, %v1354_v19  ;;  %v1355_v2 = vsub.f32 %v1333_v39, %v1353_v22 }
 0x406   :  { %1672 = vpow2.f32 %v1119_v13  ;;  %v1361_v25 = vsub.f32 %v1351_v63, %v1353_v22 }
 0x407   :  { %v1359_v26 = vmul.f32 1.442695, %v1356_v23  ;;  %v1365_v27 = vmul.f32 1.442695, %v1362_v24  ;;  %v1357_v5 = vmul.f32 1.442695, %v1355_v2 }
 0x408   :  { %v1363_v4 = vmul.f32 1.442695, %v1361_v25 }
 0x409   :  { %v1659_v28 = vpop.eup %1658  ;;  %1674 = vpow2.f32 %v1359_v26 }
 0x40a   :  { %v1661_v29 = vpop.eup %1660  ;;  %1676 = vpow2.f32 %v1365_v27 }
 0x40b   :  { %v1663_v30 = vpop.eup %1662  ;;  %v1124_v36 = vadd.f32 %v1661_v29, %v1659_v28  ;;  %1678 = vpow2.f32 %v1357_v5 }
 0x40c   :  { %v1665_v31 = vpop.eup %1664  ;;  %1680 = vpow2.f32 %v1363_v4 }
 0x40d   :  { %v1667_v32 = vpop.eup %1666  ;;  %1682 = vrcp.f32 %v1124_v36  ;;  %v1123_v9 = vadd.f32 %v1665_v31, %v1663_v30 }
 0x40e   :  { %v1669_v43 = vpop.eup %1668 }
 0x40f   :  { %v1671_v35 = vpop.eup %1670  ;;  %1684 = vrcp.f32 %v1123_v9  ;;  %v1126_v10 = vadd.f32 %v1669_v43, %v1667_v32 }
 0x410   :  { %v1673_v47 = vpop.eup %1672 }
 0x411   :  { %1686 = vrcp.f32 %v1126_v10  ;;  %v1125_v50 = vadd.f32 %v1673_v47, %v1671_v35 }
 0x413   :  { %v1675_v39 = vpop.eup %1674  ;;  %1688 = vrcp.f32 %v1125_v50 }
 0x414   :  { %v1677_v51 = vpop.eup %1676 }
 0x415   :  { %v1679_v17 = vpop.eup %1678  ;;  %v1368_v54 = vadd.f32 %v1677_v51, %v1675_v39 }
 0x416   :  { %v1681_v20 = vpop.eup %1680 }
 0x417   :  { %v1683_v37 = vpop.eup %1682  ;;  %1690 = vrcp.f32 %v1368_v54  ;;  %v1367_v52 = vadd.f32 %v1681_v20, %v1679_v17 }
 0x418   :  { %v1132_v33 = vmul.f32 %v1683_v37, %v1659_v28  ;;  %v1140_v53 = vmul.f32 %v1683_v37, %v1661_v29 }
 0x419   :  { %v1685_v40 = vpop.eup %1684  ;;  %1692 = vrcp.f32 %v1367_v52 }
 0x41a   :  { %v1136_v46 = vmul.f32 %v1132_v33, %v2006_v18  ;;  %v1144_v49 = vmul.f32 %v2064_v7, %v1140_v53  ;;  %v1131_v55 = vmul.f32 %v1685_v40, %v1663_v30  ;;  %v1139_v34 = vmul.f32 %v1685_v40, %v1665_v31 }
 0x41b   :  { %v1687_v15 = vpop.eup %1686 }
 0x41c   :  { %v1148_v58 = vadd.f32 %v1144_v49, %v1136_v46  ;;  %v1135_v60 = vmul.f32 %v1131_v55, %v2004_v48  ;;  %v1143_v0 = vmul.f32 %v1139_v34, %v2066_v59  ;;  %v1134_v61 = vmul.f32 %v1687_v15, %v1667_v32 }
 0x41d   :  { %v1689_v1 = vpop.eup %1688  ;;  %v1142_v56 = vmul.f32 %v1687_v15, %v1669_v43 }
 0x41e   :  { %v1152_v57 = vmax.f32 %v1148_v58, 0.0  ;;  %v1147_v3 = vadd.f32 %v1143_v0, %v1135_v60  ;;  %v1138_v62 = vmul.f32 %v1134_v61, %v2023_v12  ;;  %v1133_v6 = vmul.f32 %v1689_v1, %v1671_v35 }
 0x41f   :  { %v1146_v18 = vmul.f32 %v2069_v38, %v1142_v56  ;;  %v1141_v8 = vmul.f32 %v1689_v1, %v1673_v47 }
 0x420   :  { %1384 = vst [vmem:[%s2167_s11 + $0x8] sm:$0xff] %v1152_v57  ;;  %v1151_v7 = vmax.f32 %v1147_v3, 0.0  ;;  %v1137_v48 = vmul.f32 %v1133_v6, %v2034_v14 }
 0x421   :  { %v1691_v63 = vpop.eup %1690  ;;  %v1150_v59 = vadd.f32 %v1146_v18, %v1138_v62  ;;  %v1145_v41 = vmul.f32 %v1141_v8, %v2072_v11 }
 0x422   :  { %1383 = vst [vmem:[%s2167_s11] sm:$0xff] %v1151_v7  ;;  %v1372_v12 = vmul.f32 %v1691_v63, %v1675_v39  ;;  %v1376_v13 = vmul.f32 %v1691_v63, %v1677_v51 }
 0x423   :  { %v1693_v16 = vpop.eup %1692  ;;  %v1154_v38 = vmax.f32 %v1150_v59, 0.0  ;;  %v1149_v19 = vadd.f32 %v1145_v41, %v1137_v48 }
 0x424   :  { %v1374_v22 = vmul.f32 %v1372_v12, %v2011_v42  ;;  %v1378_v23 = vmul.f32 %v1376_v13, %v2078_v21  ;;  %v1371_v24 = vmul.f32 %v1693_v16, %v1679_v17  ;;  %v1375_v2 = vmul.f32 %v1693_v16, %v1681_v20 }
 0x425   :  { %1386 = vst [vmem:[%s2167_s11 + $0x18] sm:$0xff] %v1154_v38  ;;  %v1153_v14 = vmax.f32 %v1149_v19, 0.0 }
 0x426   :  { %v1380_v11 = vadd.f32 %v1378_v23, %v1374_v22  ;;  %v1373_v25 = vmul.f32 %v1371_v24, %v2002_v44  ;;  %v1377_v26 = vmul.f32 %v1375_v2, %v2074_v45 }
 0x427   :  { %1385 = vst [vmem:[%s2167_s11 + $0x10] sm:$0xff] %v1153_v14 }
 0x428   :  { %v1382_v27 = vmax.f32 %v1380_v11, 0.0  ;;  %v1379_v42 = vadd.f32 %v1377_v26, %v1373_v25 }
 0x42a   :  { %1388 = vst [vmem:[%s2168_s12 + $0x8] sm:$0xff] %v1382_v27  ;;  %v1381_v21 = vmax.f32 %v1379_v42, 0.0 }
 0x42c   :  { %1387 = vst [vmem:[%s2168_s12] sm:$0xff] %v1381_v21 }

</bundles_post_ra>
